<compile_context>
chip_gen: v5e
topology: v5e:2x2
jax: 0.10.0
libtpu: 0.0.40
codegen_flags: <defaults>
</compile_context>

<pallas_src>
import functools

import jax
import jax.numpy as jnp
from jax.experimental import pallas as pl
from jax.experimental.pallas import tpu as pltpu

EPS = 1e-5
NEG_SLOPE = 0.2
LANES = 128


def _round_up(v, m):
    return ((v + m - 1) // m) * m


def _conv_stats_kernel(x0_ref, x1_ref, x2_ref, w_ref, mask_ref,
                       y_ref, stats_ref, *, w_pad):
    """Phase 1: 3x3x3 conv on one depth slice + per-channel partial stats.

    x{0,1,2}_ref: (1, 1, Cin, Pe)    padded input planes d+0, d+1, d+2 (bf16)
    w_ref       : (27, Cout, Cin)    weights, tap-major (bf16)
    mask_ref    : (1, Pout)          1.0 on valid plane columns, else 0.0
    y_ref       : (1, 1, Cout, Pout) conv output for this plane (bf16)
    stats_ref   : (1, 1, 2, Cout)    resident [sum, sum_sq] accumulator (f32)
    """
    dd = pl.program_id(2)

    @pl.when(dd == 0)
    def _():
        stats_ref[...] = jnp.zeros_like(stats_ref)

    cout, pout = y_ref.shape[2], y_ref.shape[3]
    acc = jnp.zeros((cout, pout), jnp.float32)
    slabs = (x0_ref, x1_ref, x2_ref)
    for kd in range(3):
        slab = slabs[kd][0, 0]                            # (Cin, Pe) bf16
        for kh in range(3):
            for kw in range(3):
                off = kh * w_pad + kw                     # lane offset of tap
                acc = acc + jnp.dot(
                    w_ref[kd * 9 + kh * 3 + kw],          # (Cout, Cin)
                    slab[:, off:off + pout],              # (Cin, Pout)
                    preferred_element_type=jnp.float32)
    y_ref[0, 0] = acc.astype(y_ref.dtype)

    # Per-channel sum / sum-of-squares over the VALID plane columns only,
    # accumulated across the 'arbitrary' depth-tile axis.
    ym = acc * mask_ref[...]                              # (Cout, Pout)
    stats_ref[0, 0, 0, :] += jnp.sum(ym, axis=-1)
    stats_ref[0, 0, 1, :] += jnp.sum(ym * acc, axis=-1)


def _norm_act_kernel(y_ref, stats_ref, o_ref, *, inv_count):
    """Phase 2: InstanceNorm(affine=False) + LeakyReLU(0.2).

    y_ref    : (1, 1, Cout, Pout) bf16 conv output plane
    stats_ref: (1, 2, Cout)       full-volume per-channel [sum, sum_sq]
    o_ref    : (1, Cout, Pout)    normalized f32 output plane (channel-major)
    """
    mean = stats_ref[0, 0] * inv_count                    # (Cout,)
    var = jnp.maximum(stats_ref[0, 1] * inv_count - mean * mean, 0.0)
    rstd = jax.lax.rsqrt(var + EPS)                       # EUP
    y = (y_ref[0, 0].astype(jnp.float32) - mean[:, None]) * rstd[:, None]
    o_ref[0] = jnp.where(y >= 0, y, NEG_SLOPE * y)


@jax.jit
def general_conv3d_pallas(x_ncdhw, weight_oidhw, bias=None):
    """Forward pass. x: (N, Cin, D, H, W) f32; weight: (Cout, Cin, 3, 3, 3).

    The conv bias is ignored: with InstanceNorm(affine=False) right after the
    conv, a per-channel bias is exactly cancelled by the mean subtraction.
    Returns (N, Cout, D, H, W) f32 (matches the PyTorch module).
    """
    del bias
    N, Cin, D, H, W = x_ncdhw.shape
    Cout = weight_oidhw.shape[0]
    Wp = W + 2
    P = (H + 2) * Wp                         # flattened padded (h', w') plane
    Pout = _round_up(H * Wp, LANES)          # output columns per plane
    Pe = _round_up(Pout + 2 * Wp + 2, LANES)  # input columns (covers max tap)

    CS = 2 if D % 2 == 0 else 1              # depth split -> 2-extent parallel axis
    Dh = D // CS

    # ---- wrapper-side layout prep (one pass; replicate pad, channel-major) ----
    xp = jnp.pad(x_ncdhw, ((0, 0), (0, 0), (1, 1), (1, 1), (1, 1)), mode="edge")
    xp = jnp.transpose(xp, (0, 2, 1, 3, 4)).reshape(N, D + 2, Cin, P)
    xp = jnp.pad(xp, ((0, 0), (0, 0), (0, 0), (0, Pe - P))).astype(jnp.bfloat16)

    # (Cout, Cin, kd, kh, kw) -> (kd, kh, kw, Cout, Cin) -> (27, Cout, Cin)
    w2 = jnp.transpose(weight_oidhw, (2, 3, 4, 0, 1)).reshape(27, Cout, Cin)
    w2 = w2.astype(jnp.bfloat16)

    # Valid-column mask of a plane: column q -> (h', w') = (q // Wp, q % Wp).
    q = jnp.arange(Pout)
    mask = (((q // Wp) < H) & ((q % Wp) < W)).astype(jnp.float32)[None, :]

    # ---- phase 1: conv (27 in-kernel taps) + per-channel partial stats --------
    y, stats = pl.pallas_call(
        functools.partial(_conv_stats_kernel, w_pad=Wp),
        out_shape=(
            jax.ShapeDtypeStruct((N, D, Cout, Pout), jnp.bfloat16),
            jax.ShapeDtypeStruct((N, CS, 2, Cout), jnp.float32),
        ),
        grid_spec=pltpu.PrefetchScalarGridSpec(
            num_scalar_prefetch=0,
            grid=(N, CS, Dh),
            in_specs=[
                pl.BlockSpec((1, 1, Cin, Pe),
                             (lambda n, c, dd, kd=kd: (n, c * Dh + dd + kd, 0, 0)))
                for kd in range(3)
            ] + [
                pl.BlockSpec((27, Cout, Cin), lambda n, c, dd: (0, 0, 0)),
                pl.BlockSpec((1, Pout), lambda n, c, dd: (0, 0)),
            ],
            out_specs=[
                pl.BlockSpec((1, 1, Cout, Pout),
                             lambda n, c, dd: (n, c * Dh + dd, 0, 0)),
                pl.BlockSpec((1, 1, 2, Cout), lambda n, c, dd: (n, c, 0, 0)),
            ],
        ),
        compiler_params=pltpu.CompilerParams(
            dimension_semantics=("parallel", "parallel", "arbitrary"),
            vmem_limit_bytes=64 * 1024 * 1024),
    )(xp, xp, xp, w2, mask)

    # Combine the depth-split stats partials (tiny reduction).
    stats_full = jnp.sum(stats, axis=1)      # (N, 2, Cout)

    # ---- phase 2: InstanceNorm + LeakyReLU, channel-major lane-dense output ---
    out_pad = pl.pallas_call(
        functools.partial(_norm_act_kernel, inv_count=1.0 / float(D * H * W)),
        out_shape=jax.ShapeDtypeStruct((N, Cout, D * Pout), jnp.float32),
        grid_spec=pltpu.PrefetchScalarGridSpec(
            num_scalar_prefetch=0,
            grid=(N, CS, Dh),
            in_specs=[
                pl.BlockSpec((1, 1, Cout, Pout),
                             lambda n, c, dd: (n, c * Dh + dd, 0, 0)),
                pl.BlockSpec((1, 2, Cout), lambda n, c, dd: (n, 0, 0)),
            ],
            out_specs=pl.BlockSpec((1, Cout, Pout),
                                   lambda n, c, dd: (n, 0, c * Dh + dd)),
        ),
        compiler_params=pltpu.CompilerParams(
            dimension_semantics=("parallel", "parallel", "parallel"),
            vmem_limit_bytes=64 * 1024 * 1024),
    )(y, stats_full)

    # Drop the plane padding: (N, Cout, D*Pout) -> (N, Cout, D, H, W).
    out = out_pad.reshape(N, Cout, D, Pout)[:, :, :, :H * Wp]
    return out.reshape(N, Cout, D, H, Wp)[..., :W]


def _reference_forward(x_ncdhw, weight_oidhw, bias):
    """Pure-JAX reference mirroring the PyTorch module (includes the bias)."""
    xp = jnp.pad(x_ncdhw, ((0, 0), (0, 0), (1, 1), (1, 1), (1, 1)), mode="edge")
    y = jax.lax.conv_general_dilated(
        xp, weight_oidhw, window_strides=(1, 1, 1), padding="VALID",
        dimension_numbers=("NCDHW", "OIDHW", "NCDHW"),
        precision=jax.lax.Precision.HIGHEST)
    y = y + bias[None, :, None, None, None]
    mean = y.mean(axis=(2, 3, 4), keepdims=True)
    var = ((y - mean) ** 2).mean(axis=(2, 3, 4), keepdims=True)
    y = (y - mean) / jnp.sqrt(var + EPS)
    return jnp.where(y >= 0, y, NEG_SLOPE * y)


if __name__ == "__main__":
    # Small shapes consistent with the module: N=2, Cin=4, Cout=8, D=H=W=16.
    N, Cin, Cout, D, H, W = 2, 4, 8, 16, 16, 16

    key = jax.random.PRNGKey(0)
    kx, kw, kb = jax.random.split(key, 3)

    x = jax.random.normal(kx, (N, Cin, D, H, W), dtype=jnp.float32)

    fan_in = Cin * 3 * 3 * 3
    bound = 1.0 / (fan_in ** 0.5)
    weight = jax.random.uniform(kw, (Cout, Cin, 3, 3, 3),
                                minval=-bound, maxval=bound, dtype=jnp.float32)
    bias = jax.random.uniform(kb, (Cout,), minval=-bound, maxval=bound,
                              dtype=jnp.float32)

    out = jax.block_until_ready(general_conv3d_pallas(x, weight, bias))
    ref = _reference_forward(x, weight, bias)

    assert out.shape == (N, Cout, D, H, W)
    # bf16 matmul operands + bf16 intermediate -> slightly looser tolerance.
    assert jnp.allclose(out, ref, rtol=3e-2, atol=3e-2), \
        float(jnp.max(jnp.abs(out - ref)))
    print("KERNEL_OK")
</pallas_src>

<mosaic_0001>
module attributes {stable_mosaic.version = 11 : i64} {
  func.func @_conv_stats_kernel(%arg0: i32, %arg1: i32, %arg2: i32, %arg3: memref<1x1x4x512xbf16, #tpu.memory_space<vmem>>, %arg4: memref<1x1x4x512xbf16, #tpu.memory_space<vmem>>, %arg5: memref<1x1x4x512xbf16, #tpu.memory_space<vmem>>, %arg6: memref<27x8x4xbf16, #tpu.memory_space<vmem>>, %arg7: memref<1x384xf32, #tpu.memory_space<vmem>>, %arg8: memref<1x1x8x384xbf16, #tpu.memory_space<vmem>>, %arg9: memref<1x1x2x8xf32, #tpu.memory_space<vmem>>) attributes {dimension_semantics = [#tpu.dimension_semantics<parallel>, #tpu.dimension_semantics<parallel>, #tpu.dimension_semantics<arbitrary>], iteration_bounds = array<i64: 2, 2, 8>, scalar_prefetch = 0 : i64, scratch_operands = 0 : i64, tpu.core_type = #tpu.core_type<tc>, window_params = [{transform_indices = @transform_0, window_bounds = array<i64: 1, 1, 4, 512>}, {transform_indices = @transform_1, window_bounds = array<i64: 1, 1, 4, 512>}, {transform_indices = @transform_2, window_bounds = array<i64: 1, 1, 4, 512>}, {pipeline_mode = #tpu.pipeline_mode<synchronous>, transform_indices = @transform_3, window_bounds = array<i64: 27, 8, 4>}, {pipeline_mode = #tpu.pipeline_mode<synchronous>, transform_indices = @transform_4, window_bounds = array<i64: 1, 384>}, {transform_indices = @transform_5, window_bounds = array<i64: 1, 1, 8, 384>}, {transform_indices = @transform_6, window_bounds = array<i64: 1, 1, 2, 8>}]} {
    %c0_i32 = arith.constant 0 : i32
    %0 = arith.cmpi eq, %arg2, %c0_i32 : i32
    %1 = arith.extui %0 : i1 to i32
    %c0_i32_0 = arith.constant 0 : i32
    %2 = arith.cmpi ne, %1, %c0_i32_0 : i32
    scf.if %2 {
      %cst_118 = arith.constant 0.000000e+00 : f32
      %167 = vector.broadcast %cst_118 : f32 to vector<1x1x2x8xf32>
      %c0_119 = arith.constant 0 : index
      %c0_120 = arith.constant 0 : index
      %c0_121 = arith.constant 0 : index
      %c0_122 = arith.constant 0 : index
      %168 = vector.load %arg9[%c0_119, %c0_120, %c0_121, %c0_122] : memref<1x1x2x8xf32, #tpu.memory_space<vmem>>, vector<1x1x2x8xf32>
      tpu.vector_store %arg9[%c0_119, %c0_120, %c0_121, %c0_122], %167 {strides = array<i32>} : memref<1x1x2x8xf32, #tpu.memory_space<vmem>>, vector<1x1x2x8xf32>,
    } else {
    }
    %cst = arith.constant 0.000000e+00 : f32
    %3 = vector.broadcast %cst : f32 to vector<8x384xf32>
    %c0 = arith.constant 0 : index
    %c0_1 = arith.constant 0 : index
    %c0_2 = arith.constant 0 : index
    %c0_3 = arith.constant 0 : index
    %4 = vector.load %arg3[%c0, %c0_1, %c0_2, %c0_3] : memref<1x1x4x512xbf16, #tpu.memory_space<vmem>>, vector<1x1x4x512xbf16>
    %5 = vector.shape_cast %4 : vector<1x1x4x512xbf16> to vector<4x512xbf16>
    %c0_4 = arith.constant 0 : index
    %c0_5 = arith.constant 0 : index
    %c0_6 = arith.constant 0 : index
    %6 = vector.load %arg6[%c0_4, %c0_5, %c0_6] : memref<27x8x4xbf16, #tpu.memory_space<vmem>>, vector<1x8x4xbf16>
    %7 = vector.shape_cast %6 : vector<1x8x4xbf16> to vector<8x4xbf16>
    %8 = vector.extract_strided_slice %5 {offsets = [0, 0], sizes = [4, 384], strides = [1, 1]} : vector<4x512xbf16> to vector<4x384xbf16>
    %cst_7 = arith.constant dense<0.000000e+00> : vector<8x384xf32>
    %9 = tpu.matmul %7, %8, %cst_7 {dimension_numbers = #tpu.dot_dimension_numbers<[1], [0], [0], [1], [0, 0, 1, 1], [], []>} : vector<8x4xbf16>, vector<4x384xbf16>, vector<8x384xf32> -> vector<8x384xf32>
    %10 = arith.addf %3, %9 : vector<8x384xf32>
    %c1 = arith.constant 1 : index
    %c0_8 = arith.constant 0 : index
    %c0_9 = arith.constant 0 : index
    %11 = vector.load %arg6[%c1, %c0_8, %c0_9] : memref<27x8x4xbf16, #tpu.memory_space<vmem>>, vector<1x8x4xbf16>
    %12 = vector.shape_cast %11 : vector<1x8x4xbf16> to vector<8x4xbf16>
    %13 = vector.extract_strided_slice %5 {offsets = [0, 1], sizes = [4, 384], strides = [1, 1]} : vector<4x512xbf16> to vector<4x384xbf16>
    %cst_10 = arith.constant dense<0.000000e+00> : vector<8x384xf32>
    %14 = tpu.matmul %12, %13, %cst_10 {dimension_numbers = #tpu.dot_dimension_numbers<[1], [0], [0], [1], [0, 0, 1, 1], [], []>} : vector<8x4xbf16>, vector<4x384xbf16>, vector<8x384xf32> -> vector<8x384xf32>
    %15 = arith.addf %10, %14 : vector<8x384xf32>
    %c2 = arith.constant 2 : index
    %c0_11 = arith.constant 0 : index
    %c0_12 = arith.constant 0 : index
    %16 = vector.load %arg6[%c2, %c0_11, %c0_12] : memref<27x8x4xbf16, #tpu.memory_space<vmem>>, vector<1x8x4xbf16>
    %17 = vector.shape_cast %16 : vector<1x8x4xbf16> to vector<8x4xbf16>
    %18 = vector.extract_strided_slice %5 {offsets = [0, 2], sizes = [4, 384], strides = [1, 1]} : vector<4x512xbf16> to vector<4x384xbf16>
    %cst_13 = arith.constant dense<0.000000e+00> : vector<8x384xf32>
    %19 = tpu.matmul %17, %18, %cst_13 {dimension_numbers = #tpu.dot_dimension_numbers<[1], [0], [0], [1], [0, 0, 1, 1], [], []>} : vector<8x4xbf16>, vector<4x384xbf16>, vector<8x384xf32> -> vector<8x384xf32>
    %20 = arith.addf %15, %19 : vector<8x384xf32>
    %c3 = arith.constant 3 : index
    %c0_14 = arith.constant 0 : index
    %c0_15 = arith.constant 0 : index
    %21 = vector.load %arg6[%c3, %c0_14, %c0_15] : memref<27x8x4xbf16, #tpu.memory_space<vmem>>, vector<1x8x4xbf16>
    %22 = vector.shape_cast %21 : vector<1x8x4xbf16> to vector<8x4xbf16>
    %23 = vector.extract_strided_slice %5 {offsets = [0, 18], sizes = [4, 384], strides = [1, 1]} : vector<4x512xbf16> to vector<4x384xbf16>
    %cst_16 = arith.constant dense<0.000000e+00> : vector<8x384xf32>
    %24 = tpu.matmul %22, %23, %cst_16 {dimension_numbers = #tpu.dot_dimension_numbers<[1], [0], [0], [1], [0, 0, 1, 1], [], []>} : vector<8x4xbf16>, vector<4x384xbf16>, vector<8x384xf32> -> vector<8x384xf32>
    %25 = arith.addf %20, %24 : vector<8x384xf32>
    %c4 = arith.constant 4 : index
    %c0_17 = arith.constant 0 : index
    %c0_18 = arith.constant 0 : index
    %26 = vector.load %arg6[%c4, %c0_17, %c0_18] : memref<27x8x4xbf16, #tpu.memory_space<vmem>>, vector<1x8x4xbf16>
    %27 = vector.shape_cast %26 : vector<1x8x4xbf16> to vector<8x4xbf16>
    %28 = vector.extract_strided_slice %5 {offsets = [0, 19], sizes = [4, 384], strides = [1, 1]} : vector<4x512xbf16> to vector<4x384xbf16>
    %cst_19 = arith.constant dense<0.000000e+00> : vector<8x384xf32>
    %29 = tpu.matmul %27, %28, %cst_19 {dimension_numbers = #tpu.dot_dimension_numbers<[1], [0], [0], [1], [0, 0, 1, 1], [], []>} : vector<8x4xbf16>, vector<4x384xbf16>, vector<8x384xf32> -> vector<8x384xf32>
    %30 = arith.addf %25, %29 : vector<8x384xf32>
    %c5 = arith.constant 5 : index
    %c0_20 = arith.constant 0 : index
    %c0_21 = arith.constant 0 : index
    %31 = vector.load %arg6[%c5, %c0_20, %c0_21] : memref<27x8x4xbf16, #tpu.memory_space<vmem>>, vector<1x8x4xbf16>
    %32 = vector.shape_cast %31 : vector<1x8x4xbf16> to vector<8x4xbf16>
    %33 = vector.extract_strided_slice %5 {offsets = [0, 20], sizes = [4, 384], strides = [1, 1]} : vector<4x512xbf16> to vector<4x384xbf16>
    %cst_22 = arith.constant dense<0.000000e+00> : vector<8x384xf32>
    %34 = tpu.matmul %32, %33, %cst_22 {dimension_numbers = #tpu.dot_dimension_numbers<[1], [0], [0], [1], [0, 0, 1, 1], [], []>} : vector<8x4xbf16>, vector<4x384xbf16>, vector<8x384xf32> -> vector<8x384xf32>
    %35 = arith.addf %30, %34 : vector<8x384xf32>
    %c6 = arith.constant 6 : index
    %c0_23 = arith.constant 0 : index
    %c0_24 = arith.constant 0 : index
    %36 = vector.load %arg6[%c6, %c0_23, %c0_24] : memref<27x8x4xbf16, #tpu.memory_space<vmem>>, vector<1x8x4xbf16>
    %37 = vector.shape_cast %36 : vector<1x8x4xbf16> to vector<8x4xbf16>
    %38 = vector.extract_strided_slice %5 {offsets = [0, 36], sizes = [4, 384], strides = [1, 1]} : vector<4x512xbf16> to vector<4x384xbf16>
    %cst_25 = arith.constant dense<0.000000e+00> : vector<8x384xf32>
    %39 = tpu.matmul %37, %38, %cst_25 {dimension_numbers = #tpu.dot_dimension_numbers<[1], [0], [0], [1], [0, 0, 1, 1], [], []>} : vector<8x4xbf16>, vector<4x384xbf16>, vector<8x384xf32> -> vector<8x384xf32>
    %40 = arith.addf %35, %39 : vector<8x384xf32>
    %c7 = arith.constant 7 : index
    %c0_26 = arith.constant 0 : index
    %c0_27 = arith.constant 0 : index
    %41 = vector.load %arg6[%c7, %c0_26, %c0_27] : memref<27x8x4xbf16, #tpu.memory_space<vmem>>, vector<1x8x4xbf16>
    %42 = vector.shape_cast %41 : vector<1x8x4xbf16> to vector<8x4xbf16>
    %43 = vector.extract_strided_slice %5 {offsets = [0, 37], sizes = [4, 384], strides = [1, 1]} : vector<4x512xbf16> to vector<4x384xbf16>
    %cst_28 = arith.constant dense<0.000000e+00> : vector<8x384xf32>
    %44 = tpu.matmul %42, %43, %cst_28 {dimension_numbers = #tpu.dot_dimension_numbers<[1], [0], [0], [1], [0, 0, 1, 1], [], []>} : vector<8x4xbf16>, vector<4x384xbf16>, vector<8x384xf32> -> vector<8x384xf32>
    %45 = arith.addf %40, %44 : vector<8x384xf32>
    %c8 = arith.constant 8 : index
    %c0_29 = arith.constant 0 : index
    %c0_30 = arith.constant 0 : index
    %46 = vector.load %arg6[%c8, %c0_29, %c0_30] : memref<27x8x4xbf16, #tpu.memory_space<vmem>>, vector<1x8x4xbf16>
    %47 = vector.shape_cast %46 : vector<1x8x4xbf16> to vector<8x4xbf16>
    %48 = vector.extract_strided_slice %5 {offsets = [0, 38], sizes = [4, 384], strides = [1, 1]} : vector<4x512xbf16> to vector<4x384xbf16>
    %cst_31 = arith.constant dense<0.000000e+00> : vector<8x384xf32>
    %49 = tpu.matmul %47, %48, %cst_31 {dimension_numbers = #tpu.dot_dimension_numbers<[1], [0], [0], [1], [0, 0, 1, 1], [], []>} : vector<8x4xbf16>, vector<4x384xbf16>, vector<8x384xf32> -> vector<8x384xf32>
    %50 = arith.addf %45, %49 : vector<8x384xf32>
    %c0_32 = arith.constant 0 : index
    %c0_33 = arith.constant 0 : index
    %c0_34 = arith.constant 0 : index
    %c0_35 = arith.constant 0 : index
    %51 = vector.load %arg4[%c0_32, %c0_33, %c0_34, %c0_35] : memref<1x1x4x512xbf16, #tpu.memory_space<vmem>>, vector<1x1x4x512xbf16>
    %52 = vector.shape_cast %51 : vector<1x1x4x512xbf16> to vector<4x512xbf16>
    %c9 = arith.constant 9 : index
    %c0_36 = arith.constant 0 : index
    %c0_37 = arith.constant 0 : index
    %53 = vector.load %arg6[%c9, %c0_36, %c0_37] : memref<27x8x4xbf16, #tpu.memory_space<vmem>>, vector<1x8x4xbf16>
    %54 = vector.shape_cast %53 : vector<1x8x4xbf16> to vector<8x4xbf16>
    %55 = vector.extract_strided_slice %52 {offsets = [0, 0], sizes = [4, 384], strides = [1, 1]} : vector<4x512xbf16> to vector<4x384xbf16>
    %cst_38 = arith.constant dense<0.000000e+00> : vector<8x384xf32>
    %56 = tpu.matmul %54, %55, %cst_38 {dimension_numbers = #tpu.dot_dimension_numbers<[1], [0], [0], [1], [0, 0, 1, 1], [], []>} : vector<8x4xbf16>, vector<4x384xbf16>, vector<8x384xf32> -> vector<8x384xf32>
    %57 = arith.addf %50, %56 : vector<8x384xf32>
    %c10 = arith.constant 10 : index
    %c0_39 = arith.constant 0 : index
    %c0_40 = arith.constant 0 : index
    %58 = vector.load %arg6[%c10, %c0_39, %c0_40] : memref<27x8x4xbf16, #tpu.memory_space<vmem>>, vector<1x8x4xbf16>
    %59 = vector.shape_cast %58 : vector<1x8x4xbf16> to vector<8x4xbf16>
    %60 = vector.extract_strided_slice %52 {offsets = [0, 1], sizes = [4, 384], strides = [1, 1]} : vector<4x512xbf16> to vector<4x384xbf16>
    %cst_41 = arith.constant dense<0.000000e+00> : vector<8x384xf32>
    %61 = tpu.matmul %59, %60, %cst_41 {dimension_numbers = #tpu.dot_dimension_numbers<[1], [0], [0], [1], [0, 0, 1, 1], [], []>} : vector<8x4xbf16>, vector<4x384xbf16>, vector<8x384xf32> -> vector<8x384xf32>
    %62 = arith.addf %57, %61 : vector<8x384xf32>
    %c11 = arith.constant 11 : index
    %c0_42 = arith.constant 0 : index
    %c0_43 = arith.constant 0 : index
    %63 = vector.load %arg6[%c11, %c0_42, %c0_43] : memref<27x8x4xbf16, #tpu.memory_space<vmem>>, vector<1x8x4xbf16>
    %64 = vector.shape_cast %63 : vector<1x8x4xbf16> to vector<8x4xbf16>
    %65 = vector.extract_strided_slice %52 {offsets = [0, 2], sizes = [4, 384], strides = [1, 1]} : vector<4x512xbf16> to vector<4x384xbf16>
    %cst_44 = arith.constant dense<0.000000e+00> : vector<8x384xf32>
    %66 = tpu.matmul %64, %65, %cst_44 {dimension_numbers = #tpu.dot_dimension_numbers<[1], [0], [0], [1], [0, 0, 1, 1], [], []>} : vector<8x4xbf16>, vector<4x384xbf16>, vector<8x384xf32> -> vector<8x384xf32>
    %67 = arith.addf %62, %66 : vector<8x384xf32>
    %c12 = arith.constant 12 : index
    %c0_45 = arith.constant 0 : index
    %c0_46 = arith.constant 0 : index
    %68 = vector.load %arg6[%c12, %c0_45, %c0_46] : memref<27x8x4xbf16, #tpu.memory_space<vmem>>, vector<1x8x4xbf16>
    %69 = vector.shape_cast %68 : vector<1x8x4xbf16> to vector<8x4xbf16>
    %70 = vector.extract_strided_slice %52 {offsets = [0, 18], sizes = [4, 384], strides = [1, 1]} : vector<4x512xbf16> to vector<4x384xbf16>
    %cst_47 = arith.constant dense<0.000000e+00> : vector<8x384xf32>
    %71 = tpu.matmul %69, %70, %cst_47 {dimension_numbers = #tpu.dot_dimension_numbers<[1], [0], [0], [1], [0, 0, 1, 1], [], []>} : vector<8x4xbf16>, vector<4x384xbf16>, vector<8x384xf32> -> vector<8x384xf32>
    %72 = arith.addf %67, %71 : vector<8x384xf32>
    %c13 = arith.constant 13 : index
    %c0_48 = arith.constant 0 : index
    %c0_49 = arith.constant 0 : index
    %73 = vector.load %arg6[%c13, %c0_48, %c0_49] : memref<27x8x4xbf16, #tpu.memory_space<vmem>>, vector<1x8x4xbf16>
    %74 = vector.shape_cast %73 : vector<1x8x4xbf16> to vector<8x4xbf16>
    %75 = vector.extract_strided_slice %52 {offsets = [0, 19], sizes = [4, 384], strides = [1, 1]} : vector<4x512xbf16> to vector<4x384xbf16>
    %cst_50 = arith.constant dense<0.000000e+00> : vector<8x384xf32>
    %76 = tpu.matmul %74, %75, %cst_50 {dimension_numbers = #tpu.dot_dimension_numbers<[1], [0], [0], [1], [0, 0, 1, 1], [], []>} : vector<8x4xbf16>, vector<4x384xbf16>, vector<8x384xf32> -> vector<8x384xf32>
    %77 = arith.addf %72, %76 : vector<8x384xf32>
    %c14 = arith.constant 14 : index
    %c0_51 = arith.constant 0 : index
    %c0_52 = arith.constant 0 : index
    %78 = vector.load %arg6[%c14, %c0_51, %c0_52] : memref<27x8x4xbf16, #tpu.memory_space<vmem>>, vector<1x8x4xbf16>
    %79 = vector.shape_cast %78 : vector<1x8x4xbf16> to vector<8x4xbf16>
    %80 = vector.extract_strided_slice %52 {offsets = [0, 20], sizes = [4, 384], strides = [1, 1]} : vector<4x512xbf16> to vector<4x384xbf16>
    %cst_53 = arith.constant dense<0.000000e+00> : vector<8x384xf32>
    %81 = tpu.matmul %79, %80, %cst_53 {dimension_numbers = #tpu.dot_dimension_numbers<[1], [0], [0], [1], [0, 0, 1, 1], [], []>} : vector<8x4xbf16>, vector<4x384xbf16>, vector<8x384xf32> -> vector<8x384xf32>
    %82 = arith.addf %77, %81 : vector<8x384xf32>
    %c15 = arith.constant 15 : index
    %c0_54 = arith.constant 0 : index
    %c0_55 = arith.constant 0 : index
    %83 = vector.load %arg6[%c15, %c0_54, %c0_55] : memref<27x8x4xbf16, #tpu.memory_space<vmem>>, vector<1x8x4xbf16>
    %84 = vector.shape_cast %83 : vector<1x8x4xbf16> to vector<8x4xbf16>
    %85 = vector.extract_strided_slice %52 {offsets = [0, 36], sizes = [4, 384], strides = [1, 1]} : vector<4x512xbf16> to vector<4x384xbf16>
    %cst_56 = arith.constant dense<0.000000e+00> : vector<8x384xf32>
    %86 = tpu.matmul %84, %85, %cst_56 {dimension_numbers = #tpu.dot_dimension_numbers<[1], [0], [0], [1], [0, 0, 1, 1], [], []>} : vector<8x4xbf16>, vector<4x384xbf16>, vector<8x384xf32> -> vector<8x384xf32>
    %87 = arith.addf %82, %86 : vector<8x384xf32>
    %c16 = arith.constant 16 : index
    %c0_57 = arith.constant 0 : index
    %c0_58 = arith.constant 0 : index
    %88 = vector.load %arg6[%c16, %c0_57, %c0_58] : memref<27x8x4xbf16, #tpu.memory_space<vmem>>, vector<1x8x4xbf16>
    %89 = vector.shape_cast %88 : vector<1x8x4xbf16> to vector<8x4xbf16>
    %90 = vector.extract_strided_slice %52 {offsets = [0, 37], sizes = [4, 384], strides = [1, 1]} : vector<4x512xbf16> to vector<4x384xbf16>
    %cst_59 = arith.constant dense<0.000000e+00> : vector<8x384xf32>
    %91 = tpu.matmul %89, %90, %cst_59 {dimension_numbers = #tpu.dot_dimension_numbers<[1], [0], [0], [1], [0, 0, 1, 1], [], []>} : vector<8x4xbf16>, vector<4x384xbf16>, vector<8x384xf32> -> vector<8x384xf32>
    %92 = arith.addf %87, %91 : vector<8x384xf32>
    %c17 = arith.constant 17 : index
    %c0_60 = arith.constant 0 : index
    %c0_61 = arith.constant 0 : index
    %93 = vector.load %arg6[%c17, %c0_60, %c0_61] : memref<27x8x4xbf16, #tpu.memory_space<vmem>>, vector<1x8x4xbf16>
    %94 = vector.shape_cast %93 : vector<1x8x4xbf16> to vector<8x4xbf16>
    %95 = vector.extract_strided_slice %52 {offsets = [0, 38], sizes = [4, 384], strides = [1, 1]} : vector<4x512xbf16> to vector<4x384xbf16>
    %cst_62 = arith.constant dense<0.000000e+00> : vector<8x384xf32>
    %96 = tpu.matmul %94, %95, %cst_62 {dimension_numbers = #tpu.dot_dimension_numbers<[1], [0], [0], [1], [0, 0, 1, 1], [], []>} : vector<8x4xbf16>, vector<4x384xbf16>, vector<8x384xf32> -> vector<8x384xf32>
    %97 = arith.addf %92, %96 : vector<8x384xf32>
    %c0_63 = arith.constant 0 : index
    %c0_64 = arith.constant 0 : index
    %c0_65 = arith.constant 0 : index
    %c0_66 = arith.constant 0 : index
    %98 = vector.load %arg5[%c0_63, %c0_64, %c0_65, %c0_66] : memref<1x1x4x512xbf16, #tpu.memory_space<vmem>>, vector<1x1x4x512xbf16>
    %99 = vector.shape_cast %98 : vector<1x1x4x512xbf16> to vector<4x512xbf16>
    %c18 = arith.constant 18 : index
    %c0_67 = arith.constant 0 : index
    %c0_68 = arith.constant 0 : index
    %100 = vector.load %arg6[%c18, %c0_67, %c0_68] : memref<27x8x4xbf16, #tpu.memory_space<vmem>>, vector<1x8x4xbf16>
    %101 = vector.shape_cast %100 : vector<1x8x4xbf16> to vector<8x4xbf16>
    %102 = vector.extract_strided_slice %99 {offsets = [0, 0], sizes = [4, 384], strides = [1, 1]} : vector<4x512xbf16> to vector<4x384xbf16>
    %cst_69 = arith.constant dense<0.000000e+00> : vector<8x384xf32>
    %103 = tpu.matmul %101, %102, %cst_69 {dimension_numbers = #tpu.dot_dimension_numbers<[1], [0], [0], [1], [0, 0, 1, 1], [], []>} : vector<8x4xbf16>, vector<4x384xbf16>, vector<8x384xf32> -> vector<8x384xf32>
    %104 = arith.addf %97, %103 : vector<8x384xf32>
    %c19 = arith.constant 19 : index
    %c0_70 = arith.constant 0 : index
    %c0_71 = arith.constant 0 : index
    %105 = vector.load %arg6[%c19, %c0_70, %c0_71] : memref<27x8x4xbf16, #tpu.memory_space<vmem>>, vector<1x8x4xbf16>
    %106 = vector.shape_cast %105 : vector<1x8x4xbf16> to vector<8x4xbf16>
    %107 = vector.extract_strided_slice %99 {offsets = [0, 1], sizes = [4, 384], strides = [1, 1]} : vector<4x512xbf16> to vector<4x384xbf16>
    %cst_72 = arith.constant dense<0.000000e+00> : vector<8x384xf32>
    %108 = tpu.matmul %106, %107, %cst_72 {dimension_numbers = #tpu.dot_dimension_numbers<[1], [0], [0], [1], [0, 0, 1, 1], [], []>} : vector<8x4xbf16>, vector<4x384xbf16>, vector<8x384xf32> -> vector<8x384xf32>
    %109 = arith.addf %104, %108 : vector<8x384xf32>
    %c20 = arith.constant 20 : index
    %c0_73 = arith.constant 0 : index
    %c0_74 = arith.constant 0 : index
    %110 = vector.load %arg6[%c20, %c0_73, %c0_74] : memref<27x8x4xbf16, #tpu.memory_space<vmem>>, vector<1x8x4xbf16>
    %111 = vector.shape_cast %110 : vector<1x8x4xbf16> to vector<8x4xbf16>
    %112 = vector.extract_strided_slice %99 {offsets = [0, 2], sizes = [4, 384], strides = [1, 1]} : vector<4x512xbf16> to vector<4x384xbf16>
    %cst_75 = arith.constant dense<0.000000e+00> : vector<8x384xf32>
    %113 = tpu.matmul %111, %112, %cst_75 {dimension_numbers = #tpu.dot_dimension_numbers<[1], [0], [0], [1], [0, 0, 1, 1], [], []>} : vector<8x4xbf16>, vector<4x384xbf16>, vector<8x384xf32> -> vector<8x384xf32>
    %114 = arith.addf %109, %113 : vector<8x384xf32>
    %c21 = arith.constant 21 : index
    %c0_76 = arith.constant 0 : index
    %c0_77 = arith.constant 0 : index
    %115 = vector.load %arg6[%c21, %c0_76, %c0_77] : memref<27x8x4xbf16, #tpu.memory_space<vmem>>, vector<1x8x4xbf16>
    %116 = vector.shape_cast %115 : vector<1x8x4xbf16> to vector<8x4xbf16>
    %117 = vector.extract_strided_slice %99 {offsets = [0, 18], sizes = [4, 384], strides = [1, 1]} : vector<4x512xbf16> to vector<4x384xbf16>
    %cst_78 = arith.constant dense<0.000000e+00> : vector<8x384xf32>
    %118 = tpu.matmul %116, %117, %cst_78 {dimension_numbers = #tpu.dot_dimension_numbers<[1], [0], [0], [1], [0, 0, 1, 1], [], []>} : vector<8x4xbf16>, vector<4x384xbf16>, vector<8x384xf32> -> vector<8x384xf32>
    %119 = arith.addf %114, %118 : vector<8x384xf32>
    %c22 = arith.constant 22 : index
    %c0_79 = arith.constant 0 : index
    %c0_80 = arith.constant 0 : index
    %120 = vector.load %arg6[%c22, %c0_79, %c0_80] : memref<27x8x4xbf16, #tpu.memory_space<vmem>>, vector<1x8x4xbf16>
    %121 = vector.shape_cast %120 : vector<1x8x4xbf16> to vector<8x4xbf16>
    %122 = vector.extract_strided_slice %99 {offsets = [0, 19], sizes = [4, 384], strides = [1, 1]} : vector<4x512xbf16> to vector<4x384xbf16>
    %cst_81 = arith.constant dense<0.000000e+00> : vector<8x384xf32>
    %123 = tpu.matmul %121, %122, %cst_81 {dimension_numbers = #tpu.dot_dimension_numbers<[1], [0], [0], [1], [0, 0, 1, 1], [], []>} : vector<8x4xbf16>, vector<4x384xbf16>, vector<8x384xf32> -> vector<8x384xf32>
    %124 = arith.addf %119, %123 : vector<8x384xf32>
    %c23 = arith.constant 23 : index
    %c0_82 = arith.constant 0 : index
    %c0_83 = arith.constant 0 : index
    %125 = vector.load %arg6[%c23, %c0_82, %c0_83] : memref<27x8x4xbf16, #tpu.memory_space<vmem>>, vector<1x8x4xbf16>
    %126 = vector.shape_cast %125 : vector<1x8x4xbf16> to vector<8x4xbf16>
    %127 = vector.extract_strided_slice %99 {offsets = [0, 20], sizes = [4, 384], strides = [1, 1]} : vector<4x512xbf16> to vector<4x384xbf16>
    %cst_84 = arith.constant dense<0.000000e+00> : vector<8x384xf32>
    %128 = tpu.matmul %126, %127, %cst_84 {dimension_numbers = #tpu.dot_dimension_numbers<[1], [0], [0], [1], [0, 0, 1, 1], [], []>} : vector<8x4xbf16>, vector<4x384xbf16>, vector<8x384xf32> -> vector<8x384xf32>
    %129 = arith.addf %124, %128 : vector<8x384xf32>
    %c24 = arith.constant 24 : index
    %c0_85 = arith.constant 0 : index
    %c0_86 = arith.constant 0 : index
    %130 = vector.load %arg6[%c24, %c0_85, %c0_86] : memref<27x8x4xbf16, #tpu.memory_space<vmem>>, vector<1x8x4xbf16>
    %131 = vector.shape_cast %130 : vector<1x8x4xbf16> to vector<8x4xbf16>
    %132 = vector.extract_strided_slice %99 {offsets = [0, 36], sizes = [4, 384], strides = [1, 1]} : vector<4x512xbf16> to vector<4x384xbf16>
    %cst_87 = arith.constant dense<0.000000e+00> : vector<8x384xf32>
    %133 = tpu.matmul %131, %132, %cst_87 {dimension_numbers = #tpu.dot_dimension_numbers<[1], [0], [0], [1], [0, 0, 1, 1], [], []>} : vector<8x4xbf16>, vector<4x384xbf16>, vector<8x384xf32> -> vector<8x384xf32>
    %134 = arith.addf %129, %133 : vector<8x384xf32>
    %c25 = arith.constant 25 : index
    %c0_88 = arith.constant 0 : index
    %c0_89 = arith.constant 0 : index
    %135 = vector.load %arg6[%c25, %c0_88, %c0_89] : memref<27x8x4xbf16, #tpu.memory_space<vmem>>, vector<1x8x4xbf16>
    %136 = vector.shape_cast %135 : vector<1x8x4xbf16> to vector<8x4xbf16>
    %137 = vector.extract_strided_slice %99 {offsets = [0, 37], sizes = [4, 384], strides = [1, 1]} : vector<4x512xbf16> to vector<4x384xbf16>
    %cst_90 = arith.constant dense<0.000000e+00> : vector<8x384xf32>
    %138 = tpu.matmul %136, %137, %cst_90 {dimension_numbers = #tpu.dot_dimension_numbers<[1], [0], [0], [1], [0, 0, 1, 1], [], []>} : vector<8x4xbf16>, vector<4x384xbf16>, vector<8x384xf32> -> vector<8x384xf32>
    %139 = arith.addf %134, %138 : vector<8x384xf32>
    %c26 = arith.constant 26 : index
    %c0_91 = arith.constant 0 : index
    %c0_92 = arith.constant 0 : index
    %140 = vector.load %arg6[%c26, %c0_91, %c0_92] : memref<27x8x4xbf16, #tpu.memory_space<vmem>>, vector<1x8x4xbf16>
    %141 = vector.shape_cast %140 : vector<1x8x4xbf16> to vector<8x4xbf16>
    %142 = vector.extract_strided_slice %99 {offsets = [0, 38], sizes = [4, 384], strides = [1, 1]} : vector<4x512xbf16> to vector<4x384xbf16>
    %cst_93 = arith.constant dense<0.000000e+00> : vector<8x384xf32>
    %143 = tpu.matmul %141, %142, %cst_93 {dimension_numbers = #tpu.dot_dimension_numbers<[1], [0], [0], [1], [0, 0, 1, 1], [], []>} : vector<8x4xbf16>, vector<4x384xbf16>, vector<8x384xf32> -> vector<8x384xf32>
    %144 = arith.addf %139, %143 : vector<8x384xf32>
    %145 = arith.truncf %144 : vector<8x384xf32> to vector<8x384xbf16>
    %c0_94 = arith.constant 0 : index
    %c0_95 = arith.constant 0 : index
    %c0_96 = arith.constant 0 : index
    %c0_97 = arith.constant 0 : index
    %146 = vector.load %arg8[%c0_94, %c0_95, %c0_96, %c0_97] : memref<1x1x8x384xbf16, #tpu.memory_space<vmem>>, vector<1x1x8x384xbf16>
    %147 = vector.shape_cast %146 : vector<1x1x8x384xbf16> to vector<8x384xbf16>
    %148 = vector.shape_cast %145 : vector<8x384xbf16> to vector<1x1x8x384xbf16>
    tpu.vector_store %arg8[%c0_94, %c0_95, %c0_96, %c0_97], %148 {strides = array<i32>} : memref<1x1x8x384xbf16, #tpu.memory_space<vmem>>, vector<1x1x8x384xbf16>,
    %c0_98 = arith.constant 0 : index
    %c0_99 = arith.constant 0 : index
    %149 = vector.load %arg7[%c0_98, %c0_99] : memref<1x384xf32, #tpu.memory_space<vmem>>, vector<1x384xf32>
    %150 = vector.broadcast %149 : vector<1x384xf32> to vector<8x384xf32>
    %151 = arith.mulf %144, %150 : vector<8x384xf32>
    %c0_100 = arith.constant 0 : index
    %c0_101 = arith.constant 0 : index
    %c0_102 = arith.constant 0 : index
    %c0_103 = arith.constant 0 : index
    %152 = vector.load %arg9[%c0_100, %c0_101, %c0_102, %c0_103] : memref<1x1x2x8xf32, #tpu.memory_space<vmem>>, vector<1x1x1x8xf32>
    %153 = vector.shape_cast %152 : vector<1x1x1x8xf32> to vector<8xf32>
    %cst_104 = arith.constant dense<0.000000e+00> : vector<8xf32>
    %154 = vector.multi_reduction <add>, %151, %cst_104 [1] : vector<8x384xf32> to vector<8xf32>
    %155 = arith.addf %153, %154 : vector<8xf32>
    %c0_105 = arith.constant 0 : index
    %c0_106 = arith.constant 0 : index
    %c0_107 = arith.constant 0 : index
    %c0_108 = arith.constant 0 : index
    %156 = vector.load %arg9[%c0_105, %c0_106, %c0_107, %c0_108] : memref<1x1x2x8xf32, #tpu.memory_space<vmem>>, vector<1x1x1x8xf32>
    %157 = vector.shape_cast %156 : vector<1x1x1x8xf32> to vector<8xf32>
    %158 = vector.shape_cast %155 : vector<8xf32> to vector<1x1x1x8xf32>
    tpu.vector_store %arg9[%c0_105, %c0_106, %c0_107, %c0_108], %158 {strides = array<i32>} : memref<1x1x2x8xf32, #tpu.memory_space<vmem>>, vector<1x1x1x8xf32>,
    %c0_109 = arith.constant 0 : index
    %c0_110 = arith.constant 0 : index
    %c1_111 = arith.constant 1 : index
    %c0_112 = arith.constant 0 : index
    %159 = vector.load %arg9[%c0_109, %c0_110, %c1_111, %c0_112] : memref<1x1x2x8xf32, #tpu.memory_space<vmem>>, vector<1x1x1x8xf32>
    %160 = vector.shape_cast %159 : vector<1x1x1x8xf32> to vector<8xf32>
    %161 = arith.mulf %151, %144 : vector<8x384xf32>
    %cst_113 = arith.constant dense<0.000000e+00> : vector<8xf32>
    %162 = vector.multi_reduction <add>, %161, %cst_113 [1] : vector<8x384xf32> to vector<8xf32>
    %163 = arith.addf %160, %162 : vector<8xf32>
    %c0_114 = arith.constant 0 : index
    %c0_115 = arith.constant 0 : index
    %c1_116 = arith.constant 1 : index
    %c0_117 = arith.constant 0 : index
    %164 = vector.load %arg9[%c0_114, %c0_115, %c1_116, %c0_117] : memref<1x1x2x8xf32, #tpu.memory_space<vmem>>, vector<1x1x1x8xf32>
    %165 = vector.shape_cast %164 : vector<1x1x1x8xf32> to vector<8xf32>
    %166 = vector.shape_cast %163 : vector<8xf32> to vector<1x1x1x8xf32>
    tpu.vector_store %arg9[%c0_114, %c0_115, %c1_116, %c0_117], %166 {strides = array<i32>} : memref<1x1x2x8xf32, #tpu.memory_space<vmem>>, vector<1x1x1x8xf32>,
    return
  }
  func.func @transform_0(%arg0: i32, %arg1: i32, %arg2: i32) -> (i32, i32, i32, i32) {
    %c8_i32 = arith.constant 8 : i32
    %0 = arith.muli %arg1, %c8_i32 : i32
    %1 = arith.addi %0, %arg2 : i32
    %c0_i32 = arith.constant 0 : i32
    %2 = arith.addi %1, %c0_i32 : i32
    %c0_i32_0 = arith.constant 0 : i32
    %c0_i32_1 = arith.constant 0 : i32
    %c0_i32_2 = arith.constant 0 : i32
    return %arg0, %2, %c0_i32_0, %c0_i32_1 : i32, i32, i32, i32
  }
  func.func @transform_1(%arg0: i32, %arg1: i32, %arg2: i32) -> (i32, i32, i32, i32) {
    %c8_i32 = arith.constant 8 : i32
    %0 = arith.muli %arg1, %c8_i32 : i32
    %1 = arith.addi %0, %arg2 : i32
    %c1_i32 = arith.constant 1 : i32
    %2 = arith.addi %1, %c1_i32 : i32
    %c0_i32 = arith.constant 0 : i32
    %c0_i32_0 = arith.constant 0 : i32
    %c0_i32_1 = arith.constant 0 : i32
    return %arg0, %2, %c0_i32, %c0_i32_0 : i32, i32, i32, i32
  }
  func.func @transform_2(%arg0: i32, %arg1: i32, %arg2: i32) -> (i32, i32, i32, i32) {
    %c8_i32 = arith.constant 8 : i32
    %0 = arith.muli %arg1, %c8_i32 : i32
    %1 = arith.addi %0, %arg2 : i32
    %c2_i32 = arith.constant 2 : i32
    %2 = arith.addi %1, %c2_i32 : i32
    %c0_i32 = arith.constant 0 : i32
    %c0_i32_0 = arith.constant 0 : i32
    %c0_i32_1 = arith.constant 0 : i32
    return %arg0, %2, %c0_i32, %c0_i32_0 : i32, i32, i32, i32
  }
  func.func @transform_3(%arg0: i32, %arg1: i32, %arg2: i32) -> (i32, i32, i32) {
    %c0_i32 = arith.constant 0 : i32
    %c0_i32_0 = arith.constant 0 : i32
    %c0_i32_1 = arith.constant 0 : i32
    %c0_i32_2 = arith.constant 0 : i32
    return %c0_i32, %c0_i32_0, %c0_i32_1 : i32, i32, i32
  }
  func.func @transform_4(%arg0: i32, %arg1: i32, %arg2: i32) -> (i32, i32) {
    %c0_i32 = arith.constant 0 : i32
    %c0_i32_0 = arith.constant 0 : i32
    %c0_i32_1 = arith.constant 0 : i32
    return %c0_i32, %c0_i32_0 : i32, i32
  }
  func.func @transform_5(%arg0: i32, %arg1: i32, %arg2: i32) -> (i32, i32, i32, i32) {
    %c8_i32 = arith.constant 8 : i32
    %0 = arith.muli %arg1, %c8_i32 : i32
    %1 = arith.addi %0, %arg2 : i32
    %c0_i32 = arith.constant 0 : i32
    %c0_i32_0 = arith.constant 0 : i32
    %c0_i32_1 = arith.constant 0 : i32
    return %arg0, %1, %c0_i32, %c0_i32_0 : i32, i32, i32, i32
  }
  func.func @transform_6(%arg0: i32, %arg1: i32, %arg2: i32) -> (i32, i32, i32, i32) {
    %c0_i32 = arith.constant 0 : i32
    %c0_i32_0 = arith.constant 0 : i32
    %c0_i32_1 = arith.constant 0 : i32
    return %arg0, %arg1, %c0_i32, %c0_i32_0 : i32, i32, i32, i32
  }
}

module attributes {stable_mosaic.version = 11 : i64} {
  func.func @_norm_act_kernel(%arg0: i32, %arg1: i32, %arg2: i32, %arg3: memref<1x1x8x384xbf16, #tpu.memory_space<vmem>>, %arg4: memref<1x2x8xf32, #tpu.memory_space<vmem>>, %arg5: memref<1x8x384xf32, #tpu.memory_space<vmem>>) attributes {dimension_semantics = [#tpu.dimension_semantics<parallel>, #tpu.dimension_semantics<parallel>, #tpu.dimension_semantics<parallel>], iteration_bounds = array<i64: 2, 2, 8>, scalar_prefetch = 0 : i64, scratch_operands = 0 : i64, tpu.core_type = #tpu.core_type<tc>, window_params = [{transform_indices = @transform_0, window_bounds = array<i64: 1, 1, 8, 384>}, {transform_indices = @transform_1, window_bounds = array<i64: 1, 2, 8>}, {transform_indices = @transform_2, window_bounds = array<i64: 1, 8, 384>}]} {
    %c0 = arith.constant 0 : index
    %c0_0 = arith.constant 0 : index
    %c0_1 = arith.constant 0 : index
    %0 = vector.load %arg4[%c0, %c0_0, %c0_1] : memref<1x2x8xf32, #tpu.memory_space<vmem>>, vector<1x1x8xf32>
    %1 = vector.shape_cast %0 : vector<1x1x8xf32> to vector<8xf32>
    %cst = arith.constant 2.44140625E-4 : f32
    %2 = vector.broadcast %cst : f32 to vector<8xf32>
    %3 = arith.mulf %1, %2 : vector<8xf32>
    %c0_2 = arith.constant 0 : index
    %c1 = arith.constant 1 : index
    %c0_3 = arith.constant 0 : index
    %4 = vector.load %arg4[%c0_2, %c1, %c0_3] : memref<1x2x8xf32, #tpu.memory_space<vmem>>, vector<1x1x8xf32>
    %5 = vector.shape_cast %4 : vector<1x1x8xf32> to vector<8xf32>
    %cst_4 = arith.constant 2.44140625E-4 : f32
    %6 = vector.broadcast %cst_4 : f32 to vector<8xf32>
    %7 = arith.mulf %5, %6 : vector<8xf32>
    %8 = arith.mulf %3, %3 : vector<8xf32>
    %9 = arith.subf %7, %8 : vector<8xf32>
    %cst_5 = arith.constant 0.000000e+00 : f32
    %10 = vector.broadcast %cst_5 : f32 to vector<8xf32>
    %11 = arith.maximumf %9, %10 : vector<8xf32>
    %cst_6 = arith.constant 9.99999974E-6 : f32
    %12 = vector.broadcast %cst_6 : f32 to vector<8xf32>
    %13 = arith.addf %11, %12 : vector<8xf32>
    %14 = math.rsqrt %13 : vector<8xf32>
    %c0_7 = arith.constant 0 : index
    %c0_8 = arith.constant 0 : index
    %c0_9 = arith.constant 0 : index
    %c0_10 = arith.constant 0 : index
    %15 = vector.load %arg3[%c0_7, %c0_8, %c0_9, %c0_10] : memref<1x1x8x384xbf16, #tpu.memory_space<vmem>>, vector<1x1x8x384xbf16>
    %16 = vector.shape_cast %15 : vector<1x1x8x384xbf16> to vector<8x384xbf16>
    %17 = arith.extf %16 : vector<8x384xbf16> to vector<8x384xf32>
    %18 = vector.shape_cast %3 : vector<8xf32> to vector<8x1xf32>
    %19 = vector.broadcast %18 : vector<8x1xf32> to vector<8x384xf32>
    %20 = arith.subf %17, %19 : vector<8x384xf32>
    %21 = vector.shape_cast %14 : vector<8xf32> to vector<8x1xf32>
    %22 = vector.broadcast %21 : vector<8x1xf32> to vector<8x384xf32>
    %23 = arith.mulf %20, %22 : vector<8x384xf32>
    %cst_11 = arith.constant 0.000000e+00 : f32
    %24 = vector.broadcast %cst_11 : f32 to vector<8x384xf32>
    %25 = arith.cmpf oge, %23, %24 : vector<8x384xf32>
    %cst_12 = arith.constant 2.000000e-01 : f32
    %26 = vector.broadcast %cst_12 : f32 to vector<8x384xf32>
    %27 = arith.mulf %26, %23 : vector<8x384xf32>
    %28 = arith.select %25, %23, %27 : vector<8x384xi1>, vector<8x384xf32>
    %c0_13 = arith.constant 0 : index
    %c0_14 = arith.constant 0 : index
    %c0_15 = arith.constant 0 : index
    %29 = vector.load %arg5[%c0_13, %c0_14, %c0_15] : memref<1x8x384xf32, #tpu.memory_space<vmem>>, vector<1x8x384xf32>
    %30 = vector.shape_cast %29 : vector<1x8x384xf32> to vector<8x384xf32>
    %31 = vector.shape_cast %28 : vector<8x384xf32> to vector<1x8x384xf32>
    tpu.vector_store %arg5[%c0_13, %c0_14, %c0_15], %31 {strides = array<i32>} : memref<1x8x384xf32, #tpu.memory_space<vmem>>, vector<1x8x384xf32>,
    return
  }
  func.func @transform_0(%arg0: i32, %arg1: i32, %arg2: i32) -> (i32, i32, i32, i32) {
    %c8_i32 = arith.constant 8 : i32
    %0 = arith.muli %arg1, %c8_i32 : i32
    %1 = arith.addi %0, %arg2 : i32
    %c0_i32 = arith.constant 0 : i32
    %c0_i32_0 = arith.constant 0 : i32
    %c0_i32_1 = arith.constant 0 : i32
    return %arg0, %1, %c0_i32, %c0_i32_0 : i32, i32, i32, i32
  }
  func.func @transform_1(%arg0: i32, %arg1: i32, %arg2: i32) -> (i32, i32, i32) {
    %c0_i32 = arith.constant 0 : i32
    %c0_i32_0 = arith.constant 0 : i32
    %c0_i32_1 = arith.constant 0 : i32
    return %arg0, %c0_i32, %c0_i32_0 : i32, i32, i32
  }
  func.func @transform_2(%arg0: i32, %arg1: i32, %arg2: i32) -> (i32, i32, i32) {
    %c8_i32 = arith.constant 8 : i32
    %0 = arith.muli %arg1, %c8_i32 : i32
    %1 = arith.addi %0, %arg2 : i32
    %c0_i32 = arith.constant 0 : i32
    %c0_i32_0 = arith.constant 0 : i32
    return %arg0, %c0_i32, %1 : i32, i32, i32
  }
}

</mosaic_0001>

<bundles_post_ra>
// kernel: general_conv3d_pallas.3
= control target key start
LH: loop header
LB: loop body
LE: loop exit
PB: predicated region body
PF: predicated region fallthrough
CT: control target
= control target key end

     0   :  { %s549_s9 = smov 0   ;;  %s551_s10 = smov 0   ;;  %s631_s0 = inlined_call_operand.vmem [shape: bf16[2,16,8,384], index: 0, kind: input, shape index: {}]   ;;  %s632_s1 = inlined_call_operand.vmem [shape: f32[2,2,8], index: 1, kind: input, shape index: {}]   ;;  %s633_s2 = inlined_call_operand.vmem [shape: f32[2,8,6144], index: 2, kind: output, shape index: {}]  }
   0x1   :  { %s553_s11 = smov 0   ;;  %s555_s12 = smov 0  }
   0x2   :  { %s557_s13 = smov 0   ;;  %s559_s14 = smov 0  }
   0x3   :  { %s561_s15 = smov 0  }
   0x4 LB: > { %s24_s16 = sadd.s32 1, %s520_s12  ;;  %s27_s17 = sadd.s32 1, %s524_s13  ;;  %s532_s15 = sphi %s561_s15, %s12_s15   ;;  %s528_s14 = sphi %s559_s14, %s639_s14   ;;  %s524_s13 = sphi %s557_s13, %s638_s13   ;;  %s520_s12 = sphi %s555_s12, %s637_s12   ;;  %s516_s11 = sphi %s553_s11, %s636_s11   ;;  %s512_s10 = sphi %s551_s10, %s635_s10   ;;  %s508_s9 = sphi %s549_s9, %s634_s9  }
   0x5   : > { %p25_p0 = scmp.ge.s32.totalorder %s24_s16, 8  ;;  %p409_p1 = scmp.ge.s32.totalorder %s532_s15, 1 }
   0x6   : > { %p160_p2 = scmp.lt.s32.totalorder %s532_s15, 33  ;;  %s31_s18 = sadd.s32 1, %s528_s14 }
   0x7   : > { %s641_s16 = smov (%p25_p0, %s24_s16), 0  ;;  %s643_s17 = smov (!%p25_p0, %s27_s17), %s524_s13 }
   0x8   : > { %p161_p3 = pnand %p409_p1, %p160_p2  ;;  %p29_p4 = scmp.ge.s32.totalorder %s643_s17, 2 }
   0x9   : > { %p200_p6 = scmp.lt.s32.totalorder (!%p161_p3), %s516_s11, 1  ;;  %s410_s23 = sshll.u32 (!%p161_p3), %s512_s10, 3 }
   0xa   : > { %s645_s17 = smov (%p29_p4, %s643_s17), 0  ;;  %s647_s18 = smov (!%p29_p4, %s31_s18), %s528_s14 }
   0xb   : > { %p33_p5 = scmp.ge.s32.totalorder %s647_s18, 2  ;;  %164 = sbr.rel (%p161_p3) target bundleno = 173 (0xad), region = 28 }
   0xc   : > { %s199_s24 = sadd.s32 (!%p161_p3), %s508_s9, %s410_s23 }
   0xd   : > { %s649_s18 = smov (%p33_p5, %s647_s18), 0  ;;  %p202_p7 = scmp.lt.s32.totalorder (!%p161_p3), %s199_s24, 15 }
   0xe   : > { %s217_s29 = smul.u32 (!%p161_p3), 3, %s199_s24 }
  0x10   : > { %v253_v0 = vlaneseq  ;;  %s651_s11 = smov (!%p200_p6, %s516_s11), 1  ;;  %p220_p8 = scmp.lt.s32.totalorder %s217_s29, 47 }
  0x11   : > { %s412_s19 = sshll.u32 %s651_s11, 1  ;;  %s418_s26 = smul.u32 48, %s651_s11 }
  0x12   : > { %v254_v1 = vshrl.u32 %v253_v0, 7  ;;  %s214_s22 = scalar_lea.vmem %s632_s1, %s412_s19  ;;  %s653_s29 = smov (!%p220_p8, %s217_s29), 47 }
  0x13   : > { %v229_v2 = vld [vmem:[%s214_s22] sm:$0x1]  ;;  %v231_v3 = vld [vmem:[%s214_s22 + $0x1] sm:$0x1]  ;;  %s203_s25 = scalar_select %p202_p7, %s199_s24, 15 }
  0x14   : > { %475 = vset.pattern.permute.xlu0 %v254_v1  ;;  %v230_v4 = vmul.f32 0.00024414063, %v229_v2  ;;  %v232_v5 = vmul.f32 0.00024414063, %v231_v3  ;;  %s223_s6 = sadd.s32 %s418_s26, %s653_s29 }
  0x15   : > { %s417_s27 = smul.u32 3, %s203_s25  ;;  %s414_s7 = sshll.u32 %s223_s6, 3 }
  0x16   : > { %v252_v6 = vperm.slane %v230_v4, 0  ;;  %v233_v7 = vmul.f32 %v230_v4, %v230_v4  ;;  %s225_s10 = scalar_lea.vmem %s633_s2, %s414_s7 }
  0x17   : > { %s206_s28 = sadd.s32 %s418_s26, %s417_s27 }
  0x18   : > { %v234_v8 = vsub.f32 %v232_v5, %v233_v7  ;;  %s411_s30 = sshll.u32 %s206_s28, 2 }
  0x19   : > { %s208_s5 = scalar_lea.vmem %s631_s0, %s411_s30 }
  0x1a   : > { %v235_v9 = vmax.f32 %v234_v8, 0.0  ;;  %v247_v20 = vld [vmem:[%s208_s5] sm:$0xff]  ;;  %v248_v21 = vld [vmem:[%s208_s5 + $0x8] sm:$0xf] }
  0x1b   : > { %v249_v22 = vunpack.c.l.bf16 %v247_v20  ;;  %v250_v23 = vunpack.c.h.bf16 %v247_v20  ;;  %v251_v24 = vunpack.c.l.bf16 %v248_v21 }
  0x1c   : > { %257 = vperm.xlu0 %475, %v252_v6   ;;  %v236_v10 = vadd.f32 1e-05, %v235_v9 }
  0x1e   : > { %476 = vrsqrt.f32 %v236_v10  ;;  %vm243_vm0 = vweird.f32 %v236_v10 }
  0x24   : > { %v477_v11 = vpop.eup %476 }
  0x25   : > { %v238_v12 = vmul.f32 %v477_v11, %v236_v10  ;;  %vm244_vm1 = vweird.f32 %v477_v11 }
  0x26   : > { %vm245_vm2 = vmor %vm243_vm0, %vm244_vm1 }
  0x27   : > { %v239_v13 = vmul.f32 %v477_v11, %v238_v12 }
  0x29   : > { %v240_v14 = vmul.f32 0.5, %v239_v13 }
  0x2b   : > { %v241_v15 = vsub.f32 1.5, %v240_v14 }
  0x2d   : > { %v242_v16 = vmul.f32 %v477_v11, %v241_v15 }
  0x2f   : > { %v246_v17 = vsel %vm245_vm2, %v477_v11, %v242_v16 }
  0x30   : > { %v262_v18 = vperm.slane %v246_v17, 0 }
  0x32   : > { %267 = vperm.xlu0 %475, %v262_v18  }
  0x8e   : > { %v258_v19 = vpop.permute.xlu0 %257 }
  0x8f   : > { %v259_v25 = vsub.f32 %v249_v22, %v258_v19  ;;  %v260_v26 = vsub.f32 %v250_v23, %v258_v19  ;;  %v261_v27 = vsub.f32 %v251_v24, %v258_v19 }
  0xa4   : > { %v268_v28 = vpop.permute.xlu0 %267 }
  0xa5   : > { %v269_v29 = vmul.f32 %v268_v28, %v259_v25  ;;  %v270_v30 = vmul.f32 %v268_v28, %v260_v26  ;;  %v271_v31 = vmul.f32 %v268_v28, %v261_v27 }
  0xa7   : > { %vm272_vm3 = vcmp.ge.f32.partialorder %v269_v29, 0.0  ;;  %vm273_vm4 = vcmp.ge.f32.partialorder %v270_v30, 0.0  ;;  %vm274_vm5 = vcmp.ge.f32.partialorder %v271_v31, 0.0  ;;  %v275_v32 = vmul.f32 0.2, %v269_v29 }
  0xa8   : > { %v276_v33 = vmul.f32 0.2, %v270_v30  ;;  %v277_v34 = vmul.f32 0.2, %v271_v31 }
  0xa9   : > { %v278_v35 = vsel %vm272_vm3, %v269_v29, %v275_v32 }
  0xaa   : > { %v279_v36 = vsel %vm273_vm4, %v270_v30, %v276_v33  ;;  %v280_v37 = vsel %vm274_vm5, %v271_v31, %v277_v34  ;;  %281 = vst [vmem:[%s225_s10] sm:$0xff] %v278_v35 }
  0xab   : > { %282 = vst [vmem:[%s225_s10 + $0x8] sm:$0xff] %v279_v36 }
  0xac   : > { %283 = vst [vmem:[%s225_s10 + $0x10] sm:$0xff] %v280_v37 }
  0xad PF: > { %s12_s15 = sadd.s32 1, %s532_s15   ;;  %s634_s9 = smov %s520_s12 }
  0xae   : > { %p9_p9 = scmp.ge.s32.totalorder %s12_s15, 34   ;;  %s635_s10 = smov %s524_s13 }
  0xaf   : > { %s636_s11 = smov %s528_s14  ;;  %s637_s12 = smov %s641_s16 }
  0xb0   : > { %s638_s13 = smov %s645_s17  ;;  %s639_s14 = smov %s649_s18 }
  0xb1   :  { %11 = sbr.rel (!%p9_p9) target bundleno = 4 (0x4), region = 61 }

// kernel: general_conv3d_pallas.2
= control target key start
LH: loop header
LB: loop body
LE: loop exit
PB: predicated region body
PF: predicated region fallthrough
CT: control target
= control target key end

     0   :  { %s3003_s21 = smov 0   ;;  %s3005_s22 = smov 0   ;;  %s3597_s0 = inlined_call_operand.vmem [shape: bf16[2,18,4,512], index: 0, kind: input, shape index: {}, may-alias: {0,1,2}]   ;;  %s3598_s1 = inlined_call_operand.vmem [shape: bf16[2,18,4,512], index: 1, kind: input, shape index: {}, may-alias: {0,1,2}]   ;;  %s3599_s2 = inlined_call_operand.vmem [shape: bf16[2,18,4,512], index: 2, kind: input, shape index: {}, may-alias: {0,1,2}]   ;;  %s3600_s3 = inlined_call_operand.vmem [shape: bf16[27,8,4], index: 3, kind: input, shape index: {}]   ;;  %s3601_s4 = inlined_call_operand.vmem [shape: f32[1,384], index: 4, kind: input, shape index: {}]   ;;  %s3602_s5 = inlined_call_operand.vmem [shape: bf16[2,16,8,384], index: 5, kind: output, shape index: {0}]   ;;  %s3603_s6 = inlined_call_operand.vmem [shape: f32[2,2,2,8], index: 6, kind: output, shape index: {1}]  }
   0x1   :  { %3605 = sst [smem:[#allocation6_spill]] %s3597_s0  ;;  %s3007_s23 = smov 0  }
   0x2   :  { %3606 = sst [smem:[#allocation7_spill]] %s3598_s1  ;;  %s3009_s24 = smov 0  }
   0x3   :  { %s3011_s25 = smov 0   ;;  %s3013_s26 = smov 0  }
   0x4   :  { %s3015_s27 = smov 0  }
   0x5 LB: > { %3607 = sst [smem:[#allocation2_spill]] %s2953_s26  ;;  %s29_s28 = sadd.s32 1, %s2945_s24  ;;  %s2957_s27 = sphi %s3015_s27, %s17_s27   ;;  %s2953_s26 = sphi %s3013_s26, %s3616_s26   ;;  %s2949_s25 = sphi %s3011_s25, %s3620_s25   ;;  %s2945_s24 = sphi %s3009_s24, %s3619_s24   ;;  %s2941_s23 = sphi %s3007_s23, %s3613_s23   ;;  %s2937_s22 = sphi %s3005_s22, %s3618_s22   ;;  %s2933_s21 = sphi %s3003_s21, %s3617_s21  }
   0x6   : > { %p30_p0 = scmp.ge.s32.totalorder %s29_s28, 8  ;;  %s32_s29 = sadd.s32 1, %s2949_s25 }
   0x7   : > { %p2711_p1 = scmp.ge.s32.totalorder %s2957_s27, 1  ;;  %p312_p2 = scmp.lt.s32.totalorder %s2957_s27, 33 }
   0x8   : > { %s3622_s28 = smov (%p30_p0, %s29_s28), 0  ;;  %s3624_s29 = smov (!%p30_p0, %s32_s29), %s2949_s25 }
   0x9   : > { %3608 = sst [smem:[#allocation3_spill]] %s3622_s28  ;;  %p313_p3 = pnand %p2711_p1, %p312_p2 }
   0xa   : > { %p34_p4 = scmp.ge.s32.totalorder %s3624_s29, 2  ;;  %s36_s30 = sadd.s32 1, %s2953_s26 }
   0xb   : > { %s2712_s7 = sshll.u32 (!%p313_p3), %s2937_s22, 3  ;;  %p388_p6 = scmp.lt.s32.totalorder (!%p313_p3), %s2941_s23, 1 }
   0xc   : > { %s3626_s29 = smov (%p34_p4, %s3624_s29), 0  ;;  %s3628_s30 = smov (!%p34_p4, %s36_s30), %s2953_s26 }
   0xd   : > { %3609 = sst [smem:[#allocation4_spill]] %s3626_s29  ;;  %p38_p5 = scmp.ge.s32.totalorder %s3628_s30, 2 }
   0xe   : > { %316 = sbr.rel (%p313_p3) target bundleno = 755 (0x2f3), region = 40  ;;  %s387_s8 = sadd.s32 (!%p313_p3), %s2933_s21, %s2712_s7 }
   0xf   : > { %s3630_s30 = smov (%p38_p5, %s3628_s30), 0  ;;  %p390_p7 = scmp.lt.s32.totalorder (!%p313_p3), %s387_s8, 17 }
  0x10   : > { %3610 = sst [smem:[#allocation5_spill]] %s3630_s30  ;;  %s401_s9 = sadd.s32 (!%p313_p3), 1, %s387_s8 }
  0x11   : > { %p404_p8 = scmp.lt.s32.totalorder (!%p313_p3), %s401_s9, 17  ;;  %s416_s13 = sadd.s32 (!%p313_p3), 2, %s387_s8 }
  0x12   : > { %s3611_s0 = sld [smem:[#allocation6_spill]] (!%p313_p3)  ;;  %p419_p9 = scmp.lt.s32.totalorder (!%p313_p3), %s416_s13, 17 }
  0x13   : > { %s3632_s23 = smov (!%p388_p6, %s2941_s23), 1  ;;  %s3634_s9 = smov (!%p404_p8, %s401_s9), 17 }
  0x14   : > { %s2835_s10 = smul.u32 72, %s3632_s23  ;;  %s2716_s15 = sshll.u32 %s3634_s9, 2 }
  0x15   : > { %s391_s11 = scalar_select %p390_p7, %s387_s8, 17 }
  0x16   : > { %s408_s17 = sadd.s32 %s2835_s10, %s2716_s15  ;;  %s3612_s1 = sld [smem:[#allocation7_spill]] }
  0x17   : > { %s2713_s12 = sshll.u32 %s391_s11, 2  ;;  %s2717_s7 = sshll.u32 %s408_s17, 1 }
  0x18   : > { %s394_s14 = sadd.s32 %s2835_s10, %s2713_s12  ;;  %p433_p10 = scmp.lt.s32.totalorder %s387_s8, 15 }
  0x19   : > { %s2714_s16 = sshll.u32 %s394_s14, 1  ;;  %s2837_s11 = smul.u32 48, %s3632_s23 }
  0x1a   : > { %s396_s20 = scalar_lea.vmem %s3611_s0, %s2714_s16  ;;  %s3636_s13 = smov (!%p419_p9, %s416_s13), 17 }
  0x1b   : > { %s3638_s8 = smov (!%p433_p10, %s387_s8), 15  ;;  %s2719_s9 = sshll.u32 %s3636_s13, 2 }
  0x1c   : > { %s3060_s28 = scalar_lea.vmem %s3612_s1, %s2717_s7  ;;  %s423_s12 = sadd.s32 %s2835_s10, %s2719_s9 }
  0x1d   : > { %s2836_s14 = smul.u32 3, %s3638_s8  ;;  %s2720_s15 = sshll.u32 %s423_s12, 1 }
  0x1e   : > { %p444_p11 = scmp.lt.s32.totalorder %s2937_s22, 1  ;;  %s3067_s17 = scalar_lea.vmem %s3599_s2, %s2720_s15 }
  0x1f   : > { %s437_s29 = sadd.s32 %s2837_s11, %s2836_s14  ;;  %s2723_s1 = sshll.u32 %s3632_s23, 1 }
  0x20   : > { %s2722_s30 = sshll.u32 %s437_s29, 2  ;;  %s3640_s22 = smov (!%p444_p11, %s2937_s22), 1 }
  0x21   : > { %s3072_s0 = scalar_lea.vmem %s3602_s5, %s2722_s30  ;;  %s447_s26 = sadd.s32 %s2723_s1, %s3640_s22 }
  0x22   : > { %s2724_s13 = sshll.u32 %s447_s26, 1  ;;  %p2725_p12 = scmp.ne.s32.totalorder %s2933_s21, 0 }
  0x23   : > { %s3079_s9 = scalar_lea.vmem %s3603_s6, %s2724_s13 }
  0x24   : > { %454 = sbr.rel (%p2725_p12) target bundleno = 43 (0x2b), region = 44 }
  0x29   : > { %vm455_vm0 = vcmask 58368   ;;  %v2959_v0 = vmov 0.0  }
  0x2a   : > { %456 = vst.msk [vmem:[%s3079_s9] sm:$0x3] %vm455_vm0, %v2959_v0 }
  0x2b PF: > { %v3083_v1 = vld [vmem:[%s396_s20] sm:$0xff]  ;;  %s2960_s1 = smov 127   ;;  %s2961_s21 = smov 126   ;;  %vm487_vm1 = vcmask 1041408   ;;  %vm483_vm2 = vcmask 31744   ;;  %vm479_vm3 = vcmask 1039360  }
  0x2c   : > { %462 = vst [vmem:[#allocation1] ss:$4 sm:$0xff] %v3083_v1  ;;  %s2962_s22 = smov 110   ;;  %s2963_s23 = smov 109   ;;  %v3126_v33 = vld [vmem:[%s3060_s28] sm:$0xff]  ;;  %vm607_vm4 = vcmask 1031168  }
  0x2d   : > { %s2964_s26 = smov 108   ;;  %s2965_s20 = smov 92   ;;  %v3149_v46 = vld [vmem:[%s3600_s3] sm:$0xf]  ;;  %vm684_vm5 = vcmask 900096   ;;  %vm761_vm6 = vcmask 891904  }
  0x2e   : > { %s2966_s11 = smov 91   ;;  %s2967_s12 = smov 90   ;;  %vm838_vm7 = vcmask 883712   ;;  %vm915_vm8 = vcmask 752640   ;;  %vm992_vm9 = vcmask 744448   ;;  %vm1069_vm10 = vcmask 736256  }
  0x2f   : > { %vm2487_vm11 = vcmask 57344  }
  0x33   : > { %v467_v2 = vld.sshfl [vmem:[#allocation1 + $0x10] sm:$0xff pattern:$0x73625140]  ;;  %v463_v3 = vld.sshfl [vmem:[#allocation1] sm:$0xff pattern:$0x73625140] }
  0x34   : > { %475 = vrot.lane.b32.xlu1 %v467_v2, %s2960_s1  ;;  %471 = vrot.lane.b32.xlu0 %v463_v3, %s2960_s1  ;;  %v469_v4 = vld.sshfl [vmem:[#allocation1 + $0x18] sm:$0xff pattern:$0x73625140]  ;;  %v465_v5 = vld.sshfl [vmem:[#allocation1 + $0x8] sm:$0xff pattern:$0x73625140] }
  0x35   : > { %536 = vst [vmem:[#allocation1] ss:$4 sm:$0xff] %v3083_v1 }
  0x3c   : > { %477 = vrot.lane.b32.xlu1 %v469_v4, %s2960_s1  ;;  %473 = vrot.lane.b32.xlu0 %v465_v5, %s2960_s1  ;;  %v3091_v6 = vld.sshfl [vmem:[#allocation1] sm:$0xff pattern:$0x73625140]  ;;  %v3093_v7 = vld.sshfl [vmem:[#allocation1 + $0x8] sm:$0xff pattern:$0x73625140] }
  0x3d   : > { %v3095_v8 = vld.sshfl [vmem:[#allocation1 + $0x10] sm:$0xff pattern:$0x73625140]  ;;  %v543_v41 = vsel %vm487_vm1, %v3091_v6, 0  ;;  %v545_v2 = vsel %vm487_vm1, %v3093_v7, 0 }
  0x3e   : > { %590 = vst [vmem:[#allocation1] ss:$4 sm:$0xff] %v3083_v1  ;;  %556 = vmatpush.bf16.msra.mxu3 %v543_v41  ;;  %v547_v6 = vsel %vm487_vm1, %v3095_v8, 0  ;;  %v2726_v7 = vld [vmem:[%s3600_s3 + $0x4] sm:$0xf] }
  0x41   : > { %2730 = vmatmul.msk.bf16.vlgmr.msra.gmra.mxu3 %vm483_vm2, %v3149_v46 }
  0x45   : > { %v597_v9 = vld.sshfl [vmem:[#allocation1 + $0x18] sm:$0xff pattern:$0x73625140]  ;;  %v593_v10 = vld.sshfl [vmem:[#allocation1 + $0x8] sm:$0xff pattern:$0x73625140] }
  0x46   : > { %605 = vrot.lane.b32.xlu1 %v597_v9, %s2961_s21  ;;  %v595_v11 = vld.sshfl [vmem:[#allocation1 + $0x10] sm:$0xff pattern:$0x73625140]  ;;  %v591_v12 = vld.sshfl [vmem:[#allocation1] sm:$0xff pattern:$0x73625140] }
  0x47   : > { %603 = vrot.lane.b32.xlu0 %v595_v11, %s2961_s21  ;;  %599 = vrot.lane.b32.xlu2 %v591_v12, %s2961_s21  ;;  %667 = vst [vmem:[#allocation1] ss:$4 sm:$0xff] %v3083_v1 }
  0x4e   : > { %v674_v13 = vld.sshfl [vmem:[#allocation1 + $0x18] sm:$0xff pattern:$0x73625140]  ;;  %v668_v14 = vld.sshfl [vmem:[#allocation1] sm:$0xff pattern:$0x73625140] }
  0x4f   : > { %682 = vrot.lane.b32.xlu1 %v674_v13, %s2962_s22  ;;  %v670_v15 = vld.sshfl [vmem:[#allocation1 + $0x8] sm:$0xff pattern:$0x73625140]  ;;  %v672_v16 = vld.sshfl [vmem:[#allocation1 + $0x10] sm:$0xff pattern:$0x73625140]  ;;  %601 = vrot.lane.b32.xlu2 %v593_v10, %s2961_s21 }
  0x50   : > { %680 = vrot.lane.b32.xlu0 %v672_v16, %s2962_s22  ;;  %744 = vst [vmem:[#allocation1] ss:$4 sm:$0xff] %v3083_v1 }
  0x57   : > { %v747_v17 = vld.sshfl [vmem:[#allocation1 + $0x8] sm:$0xff pattern:$0x73625140]  ;;  %v749_v18 = vld.sshfl [vmem:[#allocation1 + $0x10] sm:$0xff pattern:$0x73625140]  ;;  %678 = vrot.lane.b32.xlu2 %v670_v15, %s2962_s22 }
  0x58   : > { %755 = vrot.lane.b32.xlu1 %v747_v17, %s2963_s23  ;;  %v745_v19 = vld.sshfl [vmem:[#allocation1] sm:$0xff pattern:$0x73625140]  ;;  %v751_v20 = vld.sshfl [vmem:[#allocation1 + $0x18] sm:$0xff pattern:$0x73625140] }
  0x59   : > { %753 = vrot.lane.b32.xlu0 %v745_v19, %s2963_s23  ;;  %821 = vst [vmem:[#allocation1] ss:$4 sm:$0xff] %v3083_v1 }
  0x5f   : > { %676 = vrot.lane.b32.xlu2 %v668_v14, %s2962_s22 }
  0x60   : > { %v822_v21 = vld.sshfl [vmem:[#allocation1] sm:$0xff pattern:$0x73625140]  ;;  %v824_v22 = vld.sshfl [vmem:[#allocation1 + $0x8] sm:$0xff pattern:$0x73625140] }
  0x61   : > { %759 = vrot.lane.b32.xlu0 %v751_v20, %s2963_s23  ;;  %v828_v23 = vld.sshfl [vmem:[#allocation1 + $0x18] sm:$0xff pattern:$0x73625140]  ;;  %830 = vrot.lane.b32.xlu1 %v822_v21, %s2964_s26  ;;  %v826_v24 = vld.sshfl [vmem:[#allocation1 + $0x10] sm:$0xff pattern:$0x73625140] }
  0x62   : > { %898 = vst [vmem:[#allocation1] ss:$4 sm:$0xff] %v3083_v1 }
  0x67   : > { %757 = vrot.lane.b32.xlu2 %v749_v18, %s2963_s23 }
  0x69   : > { %834 = vrot.lane.b32.xlu0 %v826_v24, %s2964_s26  ;;  %v899_v25 = vld.sshfl [vmem:[#allocation1] sm:$0xff pattern:$0x73625140]  ;;  %v901_v26 = vld.sshfl [vmem:[#allocation1 + $0x8] sm:$0xff pattern:$0x73625140] }
  0x6a   : > { %v905_v27 = vld.sshfl [vmem:[#allocation1 + $0x18] sm:$0xff pattern:$0x73625140]  ;;  %907 = vrot.lane.b32.xlu1 %v899_v25, %s2965_s20  ;;  %v903_v28 = vld.sshfl [vmem:[#allocation1 + $0x10] sm:$0xff pattern:$0x73625140] }
  0x6b   : > { %975 = vst [vmem:[#allocation1] ss:$4 sm:$0xff] %v3083_v1 }
  0x6f   : > { %832 = vrot.lane.b32.xlu2 %v824_v22, %s2964_s26 }
  0x71   : > { %911 = vrot.lane.b32.xlu0 %v903_v28, %s2965_s20 }
  0x72   : > { %836 = vrot.lane.b32.xlu1 %v828_v23, %s2964_s26  ;;  %v978_v29 = vld.sshfl [vmem:[#allocation1 + $0x8] sm:$0xff pattern:$0x73625140]  ;;  %v982_v30 = vld.sshfl [vmem:[#allocation1 + $0x18] sm:$0xff pattern:$0x73625140] }
  0x73   : > { %v980_v31 = vld.sshfl [vmem:[#allocation1 + $0x10] sm:$0xff pattern:$0x73625140]  ;;  %v976_v32 = vld.sshfl [vmem:[#allocation1] sm:$0xff pattern:$0x73625140] }
  0x74   : > { %1052 = vst [vmem:[#allocation1] ss:$4 sm:$0xff] %v3083_v1 }
  0x77   : > { %909 = vrot.lane.b32.xlu2 %v901_v26, %s2965_s20  ;;  %v2733_v26 = vld [vmem:[%s3600_s3 + $0x8] sm:$0xf] }
  0x79   : > { %986 = vrot.lane.b32.xlu0 %v978_v29, %s2966_s11 }
  0x7a   : > { %988 = vrot.lane.b32.xlu1 %v980_v31, %s2966_s11 }
  0x7b   : > { %v1057_v34 = vld.sshfl [vmem:[#allocation1 + $0x10] sm:$0xff pattern:$0x73625140]  ;;  %v1055_v35 = vld.sshfl [vmem:[#allocation1 + $0x8] sm:$0xff pattern:$0x73625140] }
  0x7c   : > { %v1053_v36 = vld.sshfl [vmem:[#allocation1] sm:$0xff pattern:$0x73625140]  ;;  %v1059_v37 = vld.sshfl [vmem:[#allocation1 + $0x18] sm:$0xff pattern:$0x73625140] }
  0x7d   : > { %1131 = vst [vmem:[#allocation1] ss:$4 sm:$0xff] %v3126_v33 }
  0x7f   : > { %913 = vrot.lane.b32.xlu2 %v905_v27, %s2965_s20 }
  0x81   : > { %984 = vrot.lane.b32.xlu0 %v976_v32, %s2966_s11 }
  0x82   : > { %1061 = vrot.lane.b32.xlu1 %v1053_v36, %s2967_s12 }
  0x84   : > { %v3132_v38 = vld.sshfl [vmem:[#allocation1] sm:$0xff pattern:$0x73625140]  ;;  %v3134_v39 = vld.sshfl [vmem:[#allocation1 + $0x8] sm:$0xff pattern:$0x73625140] }
  0x85   : > { %v3136_v40 = vld.sshfl [vmem:[#allocation1 + $0x10] sm:$0xff pattern:$0x73625140] }
  0x86   : > { %1188 = vst [vmem:[#allocation1] ss:$4 sm:$0xff] %v3126_v33 }
  0x87   : > { %990 = vrot.lane.b32.xlu2 %v982_v30, %s2966_s11 }
  0x89   : > { %1065 = vrot.lane.b32.xlu0 %v1057_v34, %s2967_s12 }
  0x8a   : > { %1067 = vrot.lane.b32.xlu1 %v1059_v37, %s2967_s12 }
  0x8d   : > { %v1191_v42 = vld.sshfl [vmem:[#allocation1 + $0x8] sm:$0xff pattern:$0x73625140]  ;;  %v1195_v43 = vld.sshfl [vmem:[#allocation1 + $0x18] sm:$0xff pattern:$0x73625140] }
  0x8e   : > { %v1189_v44 = vld.sshfl [vmem:[#allocation1] sm:$0xff pattern:$0x73625140]  ;;  %v1193_v45 = vld.sshfl [vmem:[#allocation1 + $0x10] sm:$0xff pattern:$0x73625140] }
  0x8f   : > { %1063 = vrot.lane.b32.xlu2 %v1055_v35, %s2967_s12  ;;  %1264 = vst [vmem:[#allocation1] ss:$4 sm:$0xff] %v3126_v33 }
  0x91   : > { %1199 = vrot.lane.b32.xlu0 %v1191_v42, %s2960_s1 }
  0x92   : > { %1201 = vrot.lane.b32.xlu1 %v1193_v45, %s2960_s1 }
  0x96   : > { %v1267_v47 = vld.sshfl [vmem:[#allocation1 + $0x8] sm:$0xff pattern:$0x73625140]  ;;  %v1271_v48 = vld.sshfl [vmem:[#allocation1 + $0x18] sm:$0xff pattern:$0x73625140] }
  0x97   : > { %v1269_v49 = vld.sshfl [vmem:[#allocation1 + $0x10] sm:$0xff pattern:$0x73625140]  ;;  %v1265_v50 = vld.sshfl [vmem:[#allocation1] sm:$0xff pattern:$0x73625140]  ;;  %1197 = vrot.lane.b32.xlu2 %v1189_v44, %s2960_s1 }
  0x98   : > { %1340 = vst [vmem:[#allocation1] ss:$4 sm:$0xff] %v3126_v33 }
  0x99   : > { %1275 = vrot.lane.b32.xlu0 %v1267_v47, %s2961_s21  ;;  %v2737_v47 = vld [vmem:[%s3600_s3 + $0xc] sm:$0xf] }
  0x9a   : > { %1277 = vrot.lane.b32.xlu1 %v1269_v49, %s2961_s21 }
  0x9f   : > { %v1341_v51 = vld.sshfl [vmem:[#allocation1] sm:$0xff pattern:$0x73625140]  ;;  %v1343_v52 = vld.sshfl [vmem:[#allocation1 + $0x8] sm:$0xff pattern:$0x73625140]  ;;  %1203 = vrot.lane.b32.xlu2 %v1195_v43, %s2960_s1 }
  0xa0   : > { %v1345_v53 = vld.sshfl [vmem:[#allocation1 + $0x10] sm:$0xff pattern:$0x73625140]  ;;  %v1347_v54 = vld.sshfl [vmem:[#allocation1 + $0x18] sm:$0xff pattern:$0x73625140] }
  0xa1   : > { %v600_v55 = vpop.permute.xlu2 %599  ;;  %1273 = vrot.lane.b32.xlu0 %v1265_v50, %s2961_s21  ;;  %1416 = vst [vmem:[#allocation1] ss:$4 sm:$0xff] %v3126_v33 }
  0xa2   : > { %1349 = vrot.lane.b32.xlu1 %v1341_v51, %s2962_s22 }
  0xa6   : > { %v476_v56 = vpop.permute.xlu1 %475  ;;  %v472_v57 = vpop.permute.xlu0 %471 }
  0xa7   : > { %1279 = vrot.lane.b32.xlu2 %v1271_v48, %s2961_s21 }
  0xa8   : > { %v1421_v58 = vld.sshfl [vmem:[#allocation1 + $0x10] sm:$0xff pattern:$0x73625140]  ;;  %v3164_v59 = vld.sshfl [vmem:[#allocation1 + $0x18] sm:$0xff pattern:$0x73625140] }
  0xa9   : > { %v602_v60 = vpop.permute.xlu2 %601  ;;  %1353 = vrot.lane.b32.xlu0 %v1345_v53, %s2962_s22  ;;  %v1417_v61 = vld.sshfl [vmem:[#allocation1] sm:$0xff pattern:$0x73625140]  ;;  %v1419_v62 = vld.sshfl [vmem:[#allocation1 + $0x8] sm:$0xff pattern:$0x73625140] }
  0xaa   : > { %1355 = vrot.lane.b32.xlu1 %v1347_v54, %s2962_s22  ;;  %1492 = vst [vmem:[#allocation1] ss:$4 sm:$0xff] %v3126_v33  ;;  %v608_v63 = vsel %vm607_vm4, %v600_v55, %v602_v60 }
  0xab   : > { %v615_v12 = vsel %vm487_vm1, %v608_v63, 0 }
  0xae   : > { %v478_v0 = vpop.permute.xlu1 %477  ;;  %v474_v1 = vpop.permute.xlu0 %473 }
  0xaf   : > { %v480_v3 = vsel %vm479_vm3, %v472_v57, %v474_v1  ;;  %v481_v4 = vsel %vm479_vm3, %v474_v1, %v476_v56  ;;  %v482_v5 = vsel %vm479_vm3, %v476_v56, %v478_v0  ;;  %1351 = vrot.lane.b32.xlu2 %v1343_v52, %s2962_s22 }
  0xb0   : > { %v489_v9 = vsel %vm487_vm1, %v480_v3, 0  ;;  %v492_v10 = vsel %vm487_vm1, %v481_v4, 0  ;;  %v495_v11 = vsel %vm487_vm1, %v482_v5, 0  ;;  %v2745_v5 = vld [vmem:[%s3600_s3 + $0x14] sm:$0xf] }
  0xb1   : > { %504 = vmatpush.bf16.msra.mxu0 %v489_v9  ;;  %517 = vmatpush.bf16.msra.mxu1 %v492_v10  ;;  %v679_v13 = vpop.permute.xlu2 %678  ;;  %v1497_v8 = vld.sshfl [vmem:[#allocation1 + $0x10] sm:$0xff pattern:$0x73625140]  ;;  %v1493_v14 = vld.sshfl [vmem:[#allocation1] sm:$0xff pattern:$0x73625140] }
  0xb2   : > { %530 = vmatpush.bf16.msra.mxu2 %v495_v11  ;;  %v1495_v15 = vld.sshfl [vmem:[#allocation1 + $0x8] sm:$0xff pattern:$0x73625140]  ;;  %1429 = vrot.lane.b32.xlu1 %v1421_v58, %s2963_s23  ;;  %v1499_v16 = vld.sshfl [vmem:[#allocation1 + $0x18] sm:$0xff pattern:$0x73625140] }
  0xb3   : > { %1427 = vrot.lane.b32.xlu0 %v1419_v62, %s2963_s23  ;;  %1568 = vst [vmem:[#allocation1] ss:$4 sm:$0xff] %v3126_v33  ;;  %v2741_v11 = vld [vmem:[%s3600_s3 + $0x10] sm:$0xf] }
  0xb4   : > { %2727 = vmatmul.msk.bf16.vlgmr.msra.gmra.mxu0 %vm483_vm2, %v2726_v7  ;;  %2728 = vmatmul.msk.bf16.vlgmr.msra.gmra.mxu1 %vm483_vm2, %v2726_v7 }
  0xb5   : > { %569 = vmatpush.bf16.msrb.mxu0 %v545_v2  ;;  %582 = vmatpush.bf16.msrb.mxu1 %v547_v6 }
  0xb6   : > { %630 = vmatpush.bf16.msrb.mxu2 %v615_v12 }
  0xb7   : > { %2729 = vmatmul.msk.bf16.vlgmr.msra.gmra.mxu2 %vm483_vm2, %v2726_v7  ;;  %1425 = vrot.lane.b32.xlu2 %v1417_v61, %s2963_s23 }
  0xb8   : > { %v606_v17 = vpop.permute.xlu1 %605 }
  0xb9   : > { %v604_v18 = vpop.permute.xlu0 %603  ;;  %v677_v19 = vpop.permute.xlu2 %676 }
  0xba   : > { %v610_v20 = vsel %vm607_vm4, %v604_v18, %v606_v17  ;;  %v609_v21 = vsel %vm607_vm4, %v602_v60, %v604_v18  ;;  %v685_v22 = vsel %vm684_vm5, %v677_v19, %v679_v13  ;;  %1505 = vrot.lane.b32.xlu1 %v1497_v8, %s2964_s26  ;;  %v1571_v35 = vld.sshfl [vmem:[#allocation1 + $0x8] sm:$0xff pattern:$0x73625140]  ;;  %v1573_v36 = vld.sshfl [vmem:[#allocation1 + $0x10] sm:$0xff pattern:$0x73625140] }
  0xbb   : > { %v621_v23 = vsel %vm487_vm1, %v610_v20, 0  ;;  %v618_v24 = vsel %vm487_vm1, %v609_v21, 0  ;;  %v692_v25 = vsel %vm487_vm1, %v685_v22, 0  ;;  %1503 = vrot.lane.b32.xlu0 %v1495_v15, %s2964_s26  ;;  %v1569_v37 = vld.sshfl [vmem:[#allocation1] sm:$0xff pattern:$0x73625140] }
  0xbc   : > { %643 = vmatpush.bf16.msrb.mxu3 %v618_v24  ;;  %656 = vmatpush.bf16.msra.mxu0 %v621_v23  ;;  %v1575_v41 = vld.sshfl [vmem:[#allocation1 + $0x18] sm:$0xff pattern:$0x73625140] }
  0xbd   : > { %707 = vmatpush.bf16.msra.mxu1 %v692_v25  ;;  %1644 = vst [vmem:[#allocation1] ss:$4 sm:$0xff] %v3126_v33 }
  0xbf   : > { %2735 = vmatmul.msk.bf16.vlgmr.msrb.gmra.mxu3 %vm483_vm2, %v2733_v26  ;;  %1501 = vrot.lane.b32.xlu2 %v1493_v14, %s2964_s26 }
  0xc1   : > { %v683_v27 = vpop.permute.xlu1 %682  ;;  %v758_v28 = vpop.permute.xlu2 %757 }
  0xc2   : > { %v681_v29 = vpop.permute.xlu0 %680  ;;  %1579 = vrot.lane.b32.xlu1 %v1571_v35, %s2965_s20  ;;  %v1138_v35 = vsel %vm487_vm1, %v3132_v38, 0 }
  0xc3   : > { %v686_v30 = vsel %vm684_vm5, %v679_v13, %v681_v29  ;;  %v687_v31 = vsel %vm684_vm5, %v681_v29, %v683_v27  ;;  %1507 = vrot.lane.b32.xlu0 %v1499_v16, %s2964_s26 }
  0xc4   : > { %v695_v32 = vsel %vm487_vm1, %v686_v30, 0  ;;  %v698_v34 = vsel %vm487_vm1, %v687_v31, 0  ;;  %2731 = vmatmul.msk.bf16.vlgmr.msrb.gmra.mxu0 %vm483_vm2, %v3149_v46  ;;  %2732 = vmatmul.msk.bf16.vlgmr.msrb.gmra.mxu1 %vm483_vm2, %v3149_v46  ;;  %v1649_v50 = vld.sshfl [vmem:[#allocation1 + $0x10] sm:$0xff pattern:$0x73625140] }
  0xc5   : > { %733 = vmatpush.bf16.msra.mxu3 %v698_v34  ;;  %720 = vmatpush.bf16.msra.mxu2 %v695_v32  ;;  %v1651_v51 = vld.sshfl [vmem:[#allocation1 + $0x18] sm:$0xff pattern:$0x73625140]  ;;  %v1645_v52 = vld.sshfl [vmem:[#allocation1] sm:$0xff pattern:$0x73625140] }
  0xc6   : > { %v1647_v53 = vld.sshfl [vmem:[#allocation1 + $0x8] sm:$0xff pattern:$0x73625140] }
  0xc7   : > { %2734 = vmatmul.msk.bf16.vlgmr.msrb.gmra.mxu2 %vm483_vm2, %v2733_v26  ;;  %1431 = vrot.lane.b32.xlu2 %v3164_v59, %s2963_s23  ;;  %1720 = vst [vmem:[#allocation1] ss:$4 sm:$0xff] %v3126_v33  ;;  %v3241_v33 = vld [vmem:[%s3067_s17] sm:$0xff] }
  0xc9   : > { %v833_v42 = vpop.permute.xlu2 %832 }
  0xca   : > { %v756_v43 = vpop.permute.xlu1 %755  ;;  %1577 = vrot.lane.b32.xlu1 %v1569_v37, %s2965_s20 }
  0xcb   : > { %v754_v44 = vpop.permute.xlu0 %753  ;;  %v763_v45 = vsel %vm761_vm6, %v756_v43, %v758_v28  ;;  %1583 = vrot.lane.b32.xlu0 %v1575_v41, %s2965_s20 }
  0xcc   : > { %v762_v46 = vsel %vm761_vm6, %v754_v44, %v756_v43  ;;  %v772_v48 = vsel %vm487_vm1, %v763_v45, 0 }
  0xcd   : > { %v769_v49 = vsel %vm487_vm1, %v762_v46, 0  ;;  %797 = vmatpush.bf16.msrb.mxu1 %v772_v48 }
  0xce   : > { %784 = vmatpush.bf16.msrb.mxu0 %v769_v49  ;;  %v1723_v61 = vld.sshfl [vmem:[#allocation1 + $0x8] sm:$0xff pattern:$0x73625140]  ;;  %v1725_v62 = vld.sshfl [vmem:[#allocation1 + $0x10] sm:$0xff pattern:$0x73625140] }
  0xcf   : > { %2740 = vmatmul.msk.bf16.vlgmr.msra.gmra.mxu3 %vm483_vm2, %v2737_v47  ;;  %1581 = vrot.lane.b32.xlu2 %v1573_v36, %s2965_s20  ;;  %v1721_v0 = vld.sshfl [vmem:[#allocation1] sm:$0xff pattern:$0x73625140]  ;;  %v1727_v1 = vld.sshfl [vmem:[#allocation1 + $0x18] sm:$0xff pattern:$0x73625140] }
  0xd0   : > { %1798 = vst [vmem:[#allocation1] ss:$4 sm:$0xff] %v3241_v33 }
  0xd1   : > { %v910_v54 = vpop.permute.xlu2 %909 }
  0xd2   : > { %1657 = vrot.lane.b32.xlu1 %v1649_v50, %s2966_s11  ;;  %v2753_v50 = vld [vmem:[%s3600_s3 + $0x1c] sm:$0xf] }
  0xd3   : > { %v760_v55 = vpop.permute.xlu0 %759  ;;  %v831_v56 = vpop.permute.xlu1 %830  ;;  %1655 = vrot.lane.b32.xlu0 %v1647_v53, %s2966_s11 }
  0xd4   : > { %v764_v57 = vsel %vm761_vm6, %v758_v28, %v760_v55  ;;  %2736 = vmatmul.msk.bf16.vlgmr.msra.gmra.mxu0 %vm483_vm2, %v2733_v26  ;;  %2738 = vmatmul.msk.bf16.vlgmr.msra.gmra.mxu1 %vm483_vm2, %v2737_v47  ;;  %v839_v58 = vsel %vm838_vm7, %v831_v56, %v833_v42  ;;  %v2749_v28 = vld [vmem:[%s3600_s3 + $0x18] sm:$0xf] }
  0xd5   : > { %v775_v59 = vsel %vm487_vm1, %v764_v57, 0  ;;  %v846_v60 = vsel %vm487_vm1, %v839_v58, 0  ;;  %v1140_v58 = vsel %vm487_vm1, %v3134_v39, 0 }
  0xd6   : > { %810 = vmatpush.bf16.msrb.mxu2 %v775_v59  ;;  %861 = vmatpush.bf16.msrb.mxu3 %v846_v60 }
  0xd7   : > { %2739 = vmatmul.msk.bf16.vlgmr.msra.gmra.mxu2 %vm483_vm2, %v2737_v47  ;;  %1653 = vrot.lane.b32.xlu2 %v1645_v52, %s2966_s11  ;;  %v3258_v12 = vld.sshfl [vmem:[#allocation1] sm:$0xff pattern:$0x73625140]  ;;  %v3260_v7 = vld.sshfl [vmem:[#allocation1 + $0x8] sm:$0xff pattern:$0x73625140] }
  0xd8   : > { %v3263_v13 = vld.sshfl [vmem:[#allocation1 + $0x10] sm:$0xff pattern:$0x73625140] }
  0xd9   : > { %v914_v63 = vpop.permute.xlu2 %913  ;;  %1855 = vst [vmem:[#allocation1] ss:$4 sm:$0xff] %v3241_v33 }
  0xda   : > { %1731 = vrot.lane.b32.xlu1 %v1723_v61, %s2967_s12 }
  0xdb   : > { %v835_v2 = vpop.permute.xlu0 %834  ;;  %1729 = vrot.lane.b32.xlu0 %v1721_v0, %s2967_s12 }
  0xdc   : > { %v840_v3 = vsel %vm838_vm7, %v833_v42, %v835_v2  ;;  %v908_v4 = vpop.permute.xlu1 %907 }
  0xdd   : > { %v849_v6 = vsel %vm487_vm1, %v840_v3, 0  ;;  %v916_v9 = vsel %vm915_vm8, %v908_v4, %v910_v54 }
  0xde   : > { %874 = vmatpush.bf16.msra.mxu0 %v849_v6  ;;  %v923_v10 = vsel %vm487_vm1, %v916_v9, 0 }
  0xdf   : > { %2746 = vmatmul.msk.bf16.vlgmr.msrb.gmra.mxu3 %vm483_vm2, %v2745_v5  ;;  %938 = vmatpush.bf16.msra.mxu2 %v923_v10 }
  0xe0   : > { %1659 = vrot.lane.b32.xlu2 %v1651_v51, %s2966_s11  ;;  %v1858_v22 = vld.sshfl [vmem:[#allocation1 + $0x8] sm:$0xff pattern:$0x73625140]  ;;  %v1860_v23 = vld.sshfl [vmem:[#allocation1 + $0x10] sm:$0xff pattern:$0x73625140] }
  0xe1   : > { %v991_v14 = vpop.permute.xlu2 %990  ;;  %v1862_v26 = vld.sshfl [vmem:[#allocation1 + $0x18] sm:$0xff pattern:$0x73625140]  ;;  %v1856_v27 = vld.sshfl [vmem:[#allocation1] sm:$0xff pattern:$0x73625140] }
  0xe2   : > { %1866 = vrot.lane.b32.xlu1 %v1858_v22, %s2960_s1  ;;  %1931 = vst [vmem:[#allocation1] ss:$4 sm:$0xff] %v3241_v33  ;;  %v3343_v22 = vpop.f32.mrf.mxu3 }
  0xe3   : > { %v912_v8 = vpop.permute.xlu0 %911  ;;  %1735 = vrot.lane.b32.xlu0 %v1727_v1, %s2967_s12 }
  0xe4   : > { %v837_v15 = vpop.permute.xlu1 %836  ;;  %2742 = vmatmul.msk.bf16.vlgmr.msrb.gmra.mxu0 %vm483_vm2, %v2741_v11  ;;  %2743 = vmatmul.msk.bf16.vlgmr.msrb.gmra.mxu1 %vm483_vm2, %v2741_v11  ;;  %v917_v16 = vsel %vm915_vm8, %v910_v54, %v912_v8  ;;  %v918_v17 = vsel %vm915_vm8, %v912_v8, %v914_v63 }
  0xe5   : > { %v841_v18 = vsel %vm838_vm7, %v835_v2, %v837_v15  ;;  %v926_v19 = vsel %vm487_vm1, %v917_v16, 0  ;;  %v929_v20 = vsel %vm487_vm1, %v918_v17, 0  ;;  %v2757_v17 = vld [vmem:[%s3600_s3 + $0x20] sm:$0xf] }
  0xe6   : > { %v852_v21 = vsel %vm487_vm1, %v841_v18, 0  ;;  %951 = vmatpush.bf16.msra.mxu3 %v926_v19  ;;  %964 = vmatpush.bf16.msrb.mxu0 %v929_v20 }
  0xe7   : > { %2744 = vmatmul.msk.bf16.vlgmr.msrb.gmra.mxu2 %vm483_vm2, %v2741_v11  ;;  %887 = vmatpush.bf16.msra.mxu1 %v852_v21 }
  0xe8   : > { %1733 = vrot.lane.b32.xlu2 %v1725_v62, %s2967_s12  ;;  %v1142_v62 = vsel %vm487_vm1, %v3136_v40, 0 }
  0xe9   : > { %v1064_v25 = vpop.permute.xlu2 %1063  ;;  %v1934_v44 = vld.sshfl [vmem:[#allocation1 + $0x8] sm:$0xff pattern:$0x73625140]  ;;  %v1938_v46 = vld.sshfl [vmem:[#allocation1 + $0x18] sm:$0xff pattern:$0x73625140] }
  0xea   : > { %1864 = vrot.lane.b32.xlu1 %v1856_v27, %s2960_s1  ;;  %v1932_v47 = vld.sshfl [vmem:[#allocation1] sm:$0xff pattern:$0x73625140]  ;;  %v1936_v48 = vld.sshfl [vmem:[#allocation1 + $0x10] sm:$0xff pattern:$0x73625140] }
  0xeb   : > { %v987_v24 = vpop.permute.xlu0 %986  ;;  %1870 = vrot.lane.b32.xlu0 %v1862_v26, %s2960_s1  ;;  %2007 = vst [vmem:[#allocation1] ss:$4 sm:$0xff] %v3241_v33 }
  0xec   : > { %v989_v29 = vpop.permute.xlu1 %988 }
  0xed   : > { %v994_v30 = vsel %vm992_vm9, %v987_v24, %v989_v29  ;;  %v995_v31 = vsel %vm992_vm9, %v989_v29, %v991_v14  ;;  %v2765_v29 = vld [vmem:[%s3600_s3 + $0x28] sm:$0xf] }
  0xee   : > { %v1003_v32 = vsel %vm487_vm1, %v994_v30, 0  ;;  %v1006_v34 = vsel %vm487_vm1, %v995_v31, 0 }
  0xef   : > { %2751 = vmatmul.msk.bf16.vlgmr.msra.gmra.mxu3 %vm483_vm2, %v2749_v28  ;;  %1028 = vmatpush.bf16.msrb.mxu2 %v1003_v32 }
  0xf0   : > { %1041 = vmatpush.bf16.msrb.mxu3 %v1006_v34  ;;  %1868 = vrot.lane.b32.xlu2 %v1860_v23, %s2960_s1 }
  0xf1   : > { %v1198_v37 = vpop.permute.xlu2 %1197 }
  0xf2   : > { %1944 = vrot.lane.b32.xlu1 %v1936_v48, %s2961_s21  ;;  %v2008_v57 = vld.sshfl [vmem:[#allocation1] sm:$0xff pattern:$0x73625140]  ;;  %v2012_v59 = vld.sshfl [vmem:[#allocation1 + $0x10] sm:$0xff pattern:$0x73625140] }
  0xf3   : > { %v985_v36 = vpop.permute.xlu0 %984  ;;  %1942 = vrot.lane.b32.xlu0 %v1934_v44, %s2961_s21  ;;  %v2014_v61 = vld.sshfl [vmem:[#allocation1 + $0x18] sm:$0xff pattern:$0x73625140]  ;;  %v2010_v2 = vld.sshfl [vmem:[#allocation1 + $0x8] sm:$0xff pattern:$0x73625140] }
  0xf4   : > { %1151 = vmatpush.bf16.msra.mxu3 %v1138_v35  ;;  %2747 = vmatmul.msk.bf16.vlgmr.msra.gmra.mxu0 %vm483_vm2, %v2745_v5  ;;  %v993_v38 = vsel %vm992_vm9, %v985_v36, %v987_v24  ;;  %v1062_v41 = vpop.permute.xlu1 %1061  ;;  %2083 = vst [vmem:[#allocation1] ss:$4 sm:$0xff] %v3241_v33 }
  0xf5   : > { %2748 = vmatmul.msk.bf16.vlgmr.msra.gmra.mxu1 %vm483_vm2, %v2745_v5  ;;  %v1000_v42 = vsel %vm487_vm1, %v993_v38, 0  ;;  %v1070_v43 = vsel %vm1069_vm10, %v1062_v41, %v1064_v25  ;;  %v2761_v5 = vld [vmem:[%s3600_s3 + $0x24] sm:$0xf] }
  0xf6   : > { %1015 = vmatpush.bf16.msrb.mxu1 %v1000_v42  ;;  %v1077_v45 = vsel %vm487_vm1, %v1070_v43, 0 }
  0xf7   : > { %2750 = vmatmul.msk.bf16.vlgmr.msra.gmra.mxu2 %vm483_vm2, %v2749_v28  ;;  %1092 = vmatpush.bf16.msra.mxu0 %v1077_v45 }
  0xf8   : > { %1940 = vrot.lane.b32.xlu2 %v1932_v47, %s2961_s21 }
  0xf9   : > { %v1204_v55 = vpop.permute.xlu2 %1203 }
  0xfa   : > { %2018 = vrot.lane.b32.xlu1 %v2010_v2, %s2962_s22 }
  0xfb   : > { %v1066_v49 = vpop.permute.xlu0 %1065  ;;  %2016 = vrot.lane.b32.xlu0 %v2008_v57, %s2962_s22  ;;  %v2084_v10 = vld.sshfl [vmem:[#allocation1] sm:$0xff pattern:$0x73625140]  ;;  %v2086_v8 = vld.sshfl [vmem:[#allocation1 + $0x8] sm:$0xff pattern:$0x73625140] }
  0xfc   : > { %v1071_v51 = vsel %vm1069_vm10, %v1064_v25, %v1066_v49  ;;  %v1068_v52 = vpop.permute.xlu1 %1067  ;;  %v2088_v16 = vld.sshfl [vmem:[#allocation1 + $0x10] sm:$0xff pattern:$0x73625140]  ;;  %v2090_v26 = vld.sshfl [vmem:[#allocation1 + $0x18] sm:$0xff pattern:$0x73625140] }
  0xfd   : > { %v1080_v53 = vsel %vm487_vm1, %v1071_v51, 0  ;;  %v1072_v54 = vsel %vm1069_vm10, %v1066_v49, %v1068_v52  ;;  %2159 = vst [vmem:[#allocation1] ss:$4 sm:$0xff] %v3241_v33  ;;  %v2769_v52 = vld [vmem:[%s3600_s3 + $0x2c] sm:$0xf] }
  0xfe   : > { %1105 = vmatpush.bf16.msra.mxu1 %v1080_v53  ;;  %v1083_v56 = vsel %vm487_vm1, %v1072_v54, 0 }
  0xff   : > { %2756 = vmatmul.msk.bf16.vlgmr.msrb.gmra.mxu3 %vm483_vm2, %v2753_v50  ;;  %1118 = vmatpush.bf16.msra.mxu2 %v1083_v56 }
 0x100   : > { %1946 = vrot.lane.b32.xlu2 %v1938_v46, %s2961_s21 }
 0x101   : > { %v1280_v40 = vpop.permute.xlu2 %1279 }
 0x102   : > { %2094 = vrot.lane.b32.xlu1 %v2086_v8, %s2963_s23 }
 0x103   : > { %v1200_v60 = vpop.permute.xlu0 %1199  ;;  %2092 = vrot.lane.b32.xlu0 %v2084_v10, %s2963_s23 }
 0x104   : > { %2752 = vmatmul.msk.bf16.vlgmr.msrb.gmra.mxu0 %vm483_vm2, %v2749_v28  ;;  %v1205_v63 = vsel %vm479_vm3, %v1198_v37, %v1200_v60  ;;  %v1202_v0 = vpop.permute.xlu1 %1201  ;;  %v560_v28 = vpop.f32.mrf.mxu3  ;;  %v2160_v36 = vld.sshfl [vmem:[#allocation1] sm:$0xff pattern:$0x73625140]  ;;  %v2162_v37 = vld.sshfl [vmem:[#allocation1 + $0x8] sm:$0xff pattern:$0x73625140] }
 0x105   : > { %2754 = vmatmul.msk.bf16.vlgmr.msrb.gmra.mxu1 %vm483_vm2, %v2753_v50  ;;  %v1212_v1 = vsel %vm487_vm1, %v1205_v63, 0  ;;  %1164 = vmatpush.bf16.msrb.mxu0 %v1140_v58  ;;  %v1206_v39 = vsel %vm479_vm3, %v1200_v60, %v1202_v0  ;;  %v1207_v14 = vsel %vm479_vm3, %v1202_v0, %v1204_v55  ;;  %v2166_v38 = vld.sshfl [vmem:[#allocation1 + $0x18] sm:$0xff pattern:$0x73625140] }
 0x106   : > { %v1215_v3 = vsel %vm487_vm1, %v1206_v39, 0  ;;  %1177 = vmatpush.bf16.msrb.mxu1 %v1142_v62  ;;  %v1218_v19 = vsel %vm487_vm1, %v1207_v14, 0  ;;  %v2164_v41 = vld.sshfl [vmem:[#allocation1 + $0x10] sm:$0xff pattern:$0x73625140] }
 0x107   : > { %2755 = vmatmul.msk.bf16.vlgmr.msrb.gmra.mxu2 %vm483_vm2, %v2753_v50  ;;  %1240 = vmatpush.bf16.msrb.mxu3 %v1215_v3  ;;  %2235 = vst [vmem:[#allocation1] ss:$4 sm:$0xff] %v3241_v33 }
 0x108   : > { %1227 = vmatpush.bf16.msrb.mxu2 %v1212_v1  ;;  %2020 = vrot.lane.b32.xlu2 %v2012_v59, %s2962_s22 }
 0x109   : > { %v1352_v18 = vpop.permute.xlu2 %1351 }
 0x10a   : > { %2098 = vrot.lane.b32.xlu1 %v2090_v26, %s2963_s23 }
 0x10b   : > { %v1276_v4 = vpop.permute.xlu0 %1275  ;;  %2022 = vrot.lane.b32.xlu0 %v2014_v61, %s2962_s22 }
 0x10c   : > { %v1278_v6 = vpop.permute.xlu1 %1277 }
 0x10d   : > { %v1283_v9 = vsel %vm607_vm4, %v1278_v6, %v1280_v40  ;;  %v1282_v15 = vsel %vm607_vm4, %v1276_v4, %v1278_v6 }
 0x10e   : > { %v1294_v11 = vsel %vm487_vm1, %v1283_v9, 0  ;;  %v1291_v20 = vsel %vm487_vm1, %v1282_v15, 0  ;;  %v2238_v50 = vld.sshfl [vmem:[#allocation1 + $0x8] sm:$0xff pattern:$0x73625140] }
 0x10f   : > { %2762 = vmatmul.msk.bf16.vlgmr.msra.gmra.mxu3 %vm483_vm2, %v2761_v5  ;;  %v2236_v51 = vld.sshfl [vmem:[#allocation1] sm:$0xff pattern:$0x73625140]  ;;  %v2240_v54 = vld.sshfl [vmem:[#allocation1 + $0x10] sm:$0xff pattern:$0x73625140] }
 0x110   : > { %1329 = vmatpush.bf16.msra.mxu3 %v1294_v11  ;;  %2096 = vrot.lane.b32.xlu2 %v2088_v16, %s2963_s23  ;;  %v2242_v59 = vld.sshfl [vmem:[#allocation1 + $0x18] sm:$0xff pattern:$0x73625140]  ;;  %v2777_v16 = vld [vmem:[%s3600_s3 + $0x34] sm:$0xf] }
 0x111   : > { %v1426_v27 = vpop.permute.xlu2 %1425  ;;  %2311 = vst [vmem:[#allocation1] ss:$4 sm:$0xff] %v3241_v33 }
 0x112   : > { %2174 = vrot.lane.b32.xlu1 %v2166_v38, %s2964_s26 }
 0x113   : > { %v1274_v21 = vpop.permute.xlu0 %1273  ;;  %2172 = vrot.lane.b32.xlu0 %v2164_v41, %s2964_s26 }
 0x114   : > { %2758 = vmatmul.msk.bf16.vlgmr.msra.gmra.mxu0 %vm483_vm2, %v2757_v17  ;;  %v1281_v23 = vsel %vm607_vm4, %v1274_v21, %v1276_v4  ;;  %v1350_v24 = vpop.permute.xlu1 %1349 }
 0x115   : > { %2759 = vmatmul.msk.bf16.vlgmr.msra.gmra.mxu1 %vm483_vm2, %v2757_v17  ;;  %1253 = vmatpush.bf16.msra.mxu0 %v1218_v19  ;;  %v1288_v25 = vsel %vm487_vm1, %v1281_v23, 0  ;;  %v1357_v32 = vsel %vm684_vm5, %v1350_v24, %v1352_v18 }
 0x116   : > { %1303 = vmatpush.bf16.msra.mxu1 %v1288_v25  ;;  %v1364_v42 = vsel %vm487_vm1, %v1357_v32, 0 }
 0x117   : > { %2760 = vmatmul.msk.bf16.vlgmr.msra.gmra.mxu2 %vm483_vm2, %v2757_v17 }
 0x118   : > { %1316 = vmatpush.bf16.msra.mxu2 %v1291_v20  ;;  %2170 = vrot.lane.b32.xlu2 %v2162_v37, %s2964_s26  ;;  %v2318_v6 = vld.sshfl [vmem:[#allocation1 + $0x18] sm:$0xff pattern:$0x73625140]  ;;  %v2312_v11 = vld.sshfl [vmem:[#allocation1] sm:$0xff pattern:$0x73625140] }
 0x119   : > { %v1502_v45 = vpop.permute.xlu2 %1501  ;;  %v2316_v8 = vld.sshfl [vmem:[#allocation1 + $0x10] sm:$0xff pattern:$0x73625140] }
 0x11a   : > { %2246 = vrot.lane.b32.xlu1 %v2238_v50, %s2965_s20 }
 0x11b   : > { %v1354_v31 = vpop.permute.xlu0 %1353  ;;  %2244 = vrot.lane.b32.xlu0 %v2236_v51, %s2965_s20 }
 0x11c   : > { %v1356_v30 = vpop.permute.xlu1 %1355  ;;  %v1358_v34 = vsel %vm684_vm5, %v1352_v18, %v1354_v31 }
 0x11d   : > { %v1359_v35 = vsel %vm684_vm5, %v1354_v31, %v1356_v30  ;;  %v1367_v43 = vsel %vm487_vm1, %v1358_v34, 0 }
 0x11e   : > { %v1370_v44 = vsel %vm487_vm1, %v1359_v35, 0 }
 0x11f   : > { %2767 = vmatmul.msk.bf16.vlgmr.msrb.gmra.mxu3 %vm483_vm2, %v2765_v29 }
 0x120   : > { %2168 = vrot.lane.b32.xlu2 %v2160_v36, %s2964_s26 }
 0x121   : > { %v1432_v53 = vpop.permute.xlu2 %1431 }
 0x122   : > { %2320 = vrot.lane.b32.xlu1 %v2312_v11, %s2966_s11  ;;  %v1807_v11 = vsel %vm487_vm1, %v3260_v7, 0 }
 0x123   : > { %2250 = vrot.lane.b32.xlu0 %v2242_v59, %s2965_s20 }
 0x124   : > { %2763 = vmatmul.msk.bf16.vlgmr.msrb.gmra.mxu0 %vm483_vm2, %v2761_v5  ;;  %v1430_v46 = vpop.permute.xlu1 %1429 }
 0x125   : > { %2764 = vmatmul.msk.bf16.vlgmr.msrb.gmra.mxu1 %vm483_vm2, %v2761_v5  ;;  %1379 = vmatpush.bf16.msrb.mxu0 %v1364_v42  ;;  %v1428_v47 = vpop.permute.xlu0 %1427  ;;  %v1435_v58 = vsel %vm761_vm6, %v1430_v46, %v1432_v53  ;;  %v2314_v5 = vld.sshfl [vmem:[#allocation1 + $0x8] sm:$0xff pattern:$0x73625140] }
 0x126   : > { %1392 = vmatpush.bf16.msrb.mxu1 %v1367_v43  ;;  %v1433_v48 = vsel %vm761_vm6, %v1426_v27, %v1428_v47  ;;  %v1434_v55 = vsel %vm761_vm6, %v1428_v47, %v1430_v46  ;;  %v1446_v3 = vsel %vm487_vm1, %v1435_v58, 0  ;;  %2387 = vst [vmem:[#allocation1] ss:$4 sm:$0xff] %v3241_v33  ;;  %v2773_v33 = vld [vmem:[%s3600_s3 + $0x30] sm:$0xf] }
 0x127   : > { %2766 = vmatmul.msk.bf16.vlgmr.msrb.gmra.mxu2 %vm483_vm2, %v2765_v29  ;;  %v1440_v49 = vsel %vm487_vm1, %v1433_v48, 0  ;;  %v1443_v1 = vsel %vm487_vm1, %v1434_v55, 0  ;;  %v2781_v47 = vld [vmem:[%s3600_s3 + $0x38] sm:$0xf] }
 0x128   : > { %1405 = vmatpush.bf16.msrb.mxu2 %v1370_v44  ;;  %1455 = vmatpush.bf16.msrb.mxu3 %v1440_v49 }
 0x129   : > { %2248 = vrot.lane.b32.xlu2 %v2240_v54, %s2965_s20  ;;  %v1582_v15 = vpop.permute.xlu2 %1581 }
 0x12b   : > { %2324 = vrot.lane.b32.xlu0 %v2316_v8, %s2966_s11 }
 0x12c   : > { %v1506_v56 = vpop.permute.xlu1 %1505 }
 0x12d   : > { %v1504_v57 = vpop.permute.xlu0 %1503  ;;  %v2388_v23 = vld.sshfl [vmem:[#allocation1] sm:$0xff pattern:$0x73625140]  ;;  %v2392_v38 = vld.sshfl [vmem:[#allocation1 + $0x10] sm:$0xff pattern:$0x73625140] }
 0x12e   : > { %v1509_v62 = vsel %vm838_vm7, %v1502_v45, %v1504_v57  ;;  %v1510_v63 = vsel %vm838_vm7, %v1504_v57, %v1506_v56  ;;  %2396 = vrot.lane.b32.xlu1 %v2388_v23, %s2967_s12 }
 0x12f   : > { %2772 = vmatmul.msk.bf16.vlgmr.msra.gmra.mxu3 %vm483_vm2, %v2769_v52  ;;  %v1519_v39 = vsel %vm487_vm1, %v1510_v63, 0  ;;  %v1516_v2 = vsel %vm487_vm1, %v1509_v62, 0 }
 0x130   : > { %1544 = vmatpush.bf16.msra.mxu3 %v1519_v39 }
 0x131   : > { %v506_v60 = vpop.f32.mrf.mxu0  ;;  %v519_v61 = vpop.f32.mrf.mxu1  ;;  %2322 = vrot.lane.b32.xlu2 %v2314_v5, %s2966_s11 }
 0x132   : > { %v559_v0 = vadd.f32 %v3343_v22, %v506_v60  ;;  %v1654_v34 = vpop.permute.xlu2 %1653 }
 0x133   : > { %2400 = vrot.lane.b32.xlu0 %v2392_v38, %s2967_s12 }
 0x134   : > { %2768 = vmatmul.msk.bf16.vlgmr.msra.gmra.mxu0 %vm483_vm2, %v2765_v29  ;;  %v1580_v14 = vpop.permute.xlu1 %1579 }
 0x135   : > { %2770 = vmatmul.msk.bf16.vlgmr.msra.gmra.mxu1 %vm483_vm2, %v2769_v52  ;;  %1468 = vmatpush.bf16.msra.mxu0 %v1443_v1  ;;  %v1508_v4 = vpop.permute.xlu0 %1507  ;;  %v1586_v19 = vsel %vm915_vm8, %v1580_v14, %v1582_v15 }
 0x136   : > { %1481 = vmatpush.bf16.msra.mxu1 %v1446_v3  ;;  %v1511_v17 = vsel %vm838_vm7, %v1506_v56, %v1508_v4  ;;  %v1595_v31 = vsel %vm487_vm1, %v1586_v19, 0  ;;  %2326 = vrot.lane.b32.xlu1 %v2318_v6, %s2966_s11  ;;  %v2390_v4 = vld.sshfl [vmem:[#allocation1 + $0x8] sm:$0xff pattern:$0x73625140] }
 0x137   : > { %2771 = vmatmul.msk.bf16.vlgmr.msra.gmra.mxu2 %vm483_vm2, %v2769_v52  ;;  %v1522_v28 = vsel %vm487_vm1, %v1511_v17, 0  ;;  %v2394_v17 = vld.sshfl [vmem:[#allocation1 + $0x18] sm:$0xff pattern:$0x73625140] }
 0x138   : > { %1531 = vmatpush.bf16.msra.mxu2 %v1516_v2 }
 0x139   : > { %v508_v9 = vpop.f32.mrf.mxu0  ;;  %v521_v10 = vpop.f32.mrf.mxu1  ;;  %2398 = vrot.lane.b32.xlu2 %v2390_v4, %s2967_s12 }
 0x13a   : > { %v532_v40 = vpop.f32.mrf.mxu2  ;;  %v1660_v48 = vpop.permute.xlu2 %1659  ;;  %v2785_v9 = vld [vmem:[%s3600_s3 + $0x3c] sm:$0xf] }
 0x13c   : > { %v1578_v29 = vpop.permute.xlu1 %1577 }
 0x13d   : > { %v1584_v20 = vpop.permute.xlu0 %1583  ;;  %v1585_v32 = vsel %vm915_vm8, %v1578_v29, %v1580_v14 }
 0x13e   : > { %v1587_v24 = vsel %vm915_vm8, %v1582_v15, %v1584_v20  ;;  %v1592_v36 = vsel %vm487_vm1, %v1585_v32, 0 }
 0x13f   : > { %2778 = vmatmul.msk.bf16.vlgmr.msrb.gmra.mxu3 %vm483_vm2, %v2777_v16  ;;  %v1598_v30 = vsel %vm487_vm1, %v1587_v24, 0  ;;  %v1805_v24 = vsel %vm487_vm1, %v3258_v12, 0 }
 0x140   : > { %1633 = vmatpush.bf16.msrb.mxu3 %v1598_v30 }
 0x141   : > { %v571_v21 = vpop.f32.mrf.mxu0  ;;  %v584_v22 = vpop.f32.mrf.mxu1  ;;  %2402 = vrot.lane.b32.xlu2 %v2394_v17, %s2967_s12 }
 0x142   : > { %v534_v18 = vpop.f32.mrf.mxu2  ;;  %v572_v25 = vadd.f32 %v571_v21, %v519_v61  ;;  %v585_v26 = vadd.f32 %v584_v22, %v532_v40  ;;  %v645_v27 = vpop.f32.mrf.mxu3 }
 0x143   : > { %v1734_v6 = vpop.permute.xlu2 %1733 }
 0x144   : > { %v663_v35 = vadd.f32 %v645_v27, %v572_v25  ;;  %2774 = vmatmul.msk.bf16.vlgmr.msrb.gmra.mxu0 %vm483_vm2, %v2773_v33  ;;  %v1658_v45 = vpop.permute.xlu1 %1657 }
 0x145   : > { %2775 = vmatmul.msk.bf16.vlgmr.msrb.gmra.mxu1 %vm483_vm2, %v2773_v33  ;;  %1557 = vmatpush.bf16.msrb.mxu0 %v1522_v28  ;;  %v1656_v46 = vpop.permute.xlu0 %1655  ;;  %v1663_v52 = vsel %vm992_vm9, %v1658_v45, %v1660_v48 }
 0x146   : > { %1607 = vmatpush.bf16.msrb.mxu1 %v1592_v36  ;;  %v1661_v49 = vsel %vm992_vm9, %v1654_v34, %v1656_v46  ;;  %v1662_v51 = vsel %vm992_vm9, %v1656_v46, %v1658_v45  ;;  %v1674_v61 = vsel %vm487_vm1, %v1663_v52, 0  ;;  %v2789_v45 = vld [vmem:[%s3600_s3 + $0x40] sm:$0xf] }
 0x147   : > { %2776 = vmatmul.msk.bf16.vlgmr.msrb.gmra.mxu2 %vm483_vm2, %v2773_v33  ;;  %v1668_v58 = vsel %vm487_vm1, %v1661_v49, 0  ;;  %v1671_v60 = vsel %vm487_vm1, %v1662_v51, 0  ;;  %v1809_v49 = vsel %vm487_vm1, %v3263_v13, 0 }
 0x148   : > { %1620 = vmatpush.bf16.msrb.mxu2 %v1595_v31 }
 0x149   : > { %v573_v42 = vpop.f32.mrf.mxu0  ;;  %v586_v43 = vpop.f32.mrf.mxu1 }
 0x14a   : > { %v632_v37 = vpop.f32.mrf.mxu2  ;;  %v647_v44 = vpop.f32.mrf.mxu3 }
 0x14b   : > { %v662_v41 = vadd.f32 %v632_v37, %v559_v0  ;;  %v1869_v7 = vpop.permute.xlu2 %1868 }
 0x14c   : > { %v1732_v59 = vpop.permute.xlu1 %1731 }
 0x14d   : > { %v1730_v62 = vpop.permute.xlu0 %1729  ;;  %v1738_v14 = vsel %vm1069_vm10, %v1732_v59, %v1734_v6 }
 0x14e   : > { %v1737_v0 = vsel %vm1069_vm10, %v1730_v62, %v1732_v59  ;;  %v1747_v33 = vsel %vm487_vm1, %v1738_v14, 0 }
 0x14f   : > { %2783 = vmatmul.msk.bf16.vlgmr.msra.gmra.mxu3 %vm483_vm2, %v2781_v47  ;;  %v1744_v1 = vsel %vm487_vm1, %v1737_v0, 0 }
 0x150   : > { %1759 = vmatpush.bf16.msra.mxu3 %v1744_v1 }
 0x151   : > { %v658_v53 = vpop.f32.mrf.mxu0  ;;  %v709_v54 = vpop.f32.mrf.mxu1 }
 0x152   : > { %v634_v50 = vpop.f32.mrf.mxu2  ;;  %v664_v55 = vadd.f32 %v658_v53, %v585_v26  ;;  %v739_v56 = vadd.f32 %v709_v54, %v662_v41  ;;  %v735_v57 = vpop.f32.mrf.mxu3 }
 0x153   : > { %v1941_v12 = vpop.permute.xlu2 %1940 }
 0x154   : > { %v741_v63 = vadd.f32 %v735_v57, %v664_v55  ;;  %2779 = vmatmul.msk.bf16.vlgmr.msra.gmra.mxu0 %vm483_vm2, %v2777_v16  ;;  %v1867_v8 = vpop.permute.xlu1 %1866 }
 0x155   : > { %2780 = vmatmul.msk.bf16.vlgmr.msra.gmra.mxu1 %vm483_vm2, %v2777_v16  ;;  %1683 = vmatpush.bf16.msra.mxu0 %v1668_v58  ;;  %v1736_v10 = vpop.permute.xlu0 %1735  ;;  %v1873_v41 = vsel %vm479_vm3, %v1867_v8, %v1869_v7 }
 0x156   : > { %1696 = vmatpush.bf16.msra.mxu1 %v1671_v60  ;;  %v1739_v16 = vsel %vm1069_vm10, %v1734_v6, %v1736_v10  ;;  %v1882_v51 = vsel %vm487_vm1, %v1873_v41, 0 }
 0x157   : > { %2782 = vmatmul.msk.bf16.vlgmr.msra.gmra.mxu2 %vm483_vm2, %v2781_v47  ;;  %v1750_v23 = vsel %vm487_vm1, %v1739_v16, 0 }
 0x158   : > { %1709 = vmatpush.bf16.msra.mxu2 %v1674_v61 }
 0x159   : > { %v660_v3 = vpop.f32.mrf.mxu0  ;;  %v711_v40 = vpop.f32.mrf.mxu1 }
 0x15a   : > { %v722_v39 = vpop.f32.mrf.mxu2  ;;  %v737_v5 = vpop.f32.mrf.mxu3 }
 0x15b   : > { %v740_v2 = vadd.f32 %v722_v39, %v663_v35  ;;  %v2793_v35 = vld [vmem:[%s3600_s3 + $0x44] sm:$0xf]  ;;  %v1947_v53 = vpop.permute.xlu2 %1946 }
 0x15c   : > { %v1865_v28 = vpop.permute.xlu1 %1864 }
 0x15d   : > { %v1871_v26 = vpop.permute.xlu0 %1870  ;;  %v1872_v42 = vsel %vm479_vm3, %v1865_v28, %v1867_v8 }
 0x15e   : > { %v1874_v34 = vsel %vm479_vm3, %v1869_v7, %v1871_v26  ;;  %v1879_v52 = vsel %vm487_vm1, %v1872_v42, 0 }
 0x15f   : > { %2788 = vmatmul.msk.bf16.vlgmr.msrb.gmra.mxu3 %vm483_vm2, %v2785_v9  ;;  %v1885_v36 = vsel %vm487_vm1, %v1874_v34, 0 }
 0x160   : > { %1831 = vmatpush.bf16.msrb.mxu3 %v1807_v11 }
 0x161   : > { %v786_v18 = vpop.f32.mrf.mxu0  ;;  %v799_v19 = vpop.f32.mrf.mxu1 }
 0x162   : > { %v724_v15 = vpop.f32.mrf.mxu2  ;;  %v816_v20 = vadd.f32 %v786_v18, %v739_v56  ;;  %v817_v21 = vadd.f32 %v799_v19, %v740_v2  ;;  %v863_v22 = vpop.f32.mrf.mxu3 }
 0x163   : > { %v2021_v61 = vpop.permute.xlu2 %2020 }
 0x164   : > { %v893_v25 = vadd.f32 %v863_v22, %v816_v20  ;;  %2784 = vmatmul.msk.bf16.vlgmr.msrb.gmra.mxu0 %vm483_vm2, %v2781_v47  ;;  %v1945_v50 = vpop.permute.xlu1 %1944 }
 0x165   : > { %2786 = vmatmul.msk.bf16.vlgmr.msrb.gmra.mxu1 %vm483_vm2, %v2785_v9  ;;  %1772 = vmatpush.bf16.msrb.mxu0 %v1747_v33  ;;  %v1943_v37 = vpop.permute.xlu0 %1942  ;;  %v1950_v3 = vsel %vm607_vm4, %v1945_v50, %v1947_v53 }
 0x166   : > { %1785 = vmatpush.bf16.msrb.mxu1 %v1750_v23  ;;  %v1948_v1 = vsel %vm607_vm4, %v1941_v12, %v1943_v37  ;;  %v1949_v2 = vsel %vm607_vm4, %v1943_v37, %v1945_v50  ;;  %v1961_v14 = vsel %vm487_vm1, %v1950_v3, 0  ;;  %v2801_v23 = vld [vmem:[%s3600_s3 + $0x4c] sm:$0xf] }
 0x167   : > { %2787 = vmatmul.msk.bf16.vlgmr.msrb.gmra.mxu2 %vm483_vm2, %v2785_v9  ;;  %v1955_v10 = vsel %vm487_vm1, %v1948_v1, 0  ;;  %v1958_v8 = vsel %vm487_vm1, %v1949_v2, 0 }
 0x168   : > { %1818 = vmatpush.bf16.msrb.mxu2 %v1805_v24 }
 0x169   : > { %v788_v30 = vpop.f32.mrf.mxu0  ;;  %v801_v31 = vpop.f32.mrf.mxu1 }
 0x16a   : > { %v812_v27 = vpop.f32.mrf.mxu2  ;;  %v865_v32 = vpop.f32.mrf.mxu3 }
 0x16b   : > { %v818_v29 = vadd.f32 %v812_v27, %v741_v63  ;;  %v2797_v63 = vld [vmem:[%s3600_s3 + $0x48] sm:$0xf]  ;;  %v2097_v17 = vpop.permute.xlu2 %2096 }
 0x16c   : > { %v2019_v60 = vpop.permute.xlu1 %2018 }
 0x16d   : > { %v2017_v56 = vpop.permute.xlu0 %2016  ;;  %v2025_v27 = vsel %vm684_vm5, %v2019_v60, %v2021_v61 }
 0x16e   : > { %v2024_v62 = vsel %vm684_vm5, %v2017_v56, %v2019_v60  ;;  %v2805_v60 = vld [vmem:[%s3600_s3 + $0x50] sm:$0xf] }
 0x16f   : > { %2794 = vmatmul.msk.bf16.vlgmr.msra.gmra.mxu3 %vm483_vm2, %v2793_v35  ;;  %v2031_v0 = vsel %vm487_vm1, %v2024_v62, 0 }
 0x170   : > { %1920 = vmatpush.bf16.msra.mxu3 %v1885_v36  ;;  %v2034_v36 = vsel %vm487_vm1, %v2025_v27, 0 }
 0x171   : > { %v876_v43 = vpop.f32.mrf.mxu0 }
 0x172   : > { %v814_v38 = vpop.f32.mrf.mxu2  ;;  %v889_v44 = vpop.f32.mrf.mxu1  ;;  %v894_v46 = vadd.f32 %v876_v43, %v817_v21 }
 0x173   : > { %v895_v47 = vadd.f32 %v889_v44, %v818_v29  ;;  %v953_v48 = vpop.f32.mrf.mxu3  ;;  %v2171_v26 = vpop.permute.xlu2 %2170 }
 0x174   : > { %v971_v54 = vadd.f32 %v953_v48, %v894_v46  ;;  %2790 = vmatmul.msk.bf16.vlgmr.msra.gmra.mxu0 %vm483_vm2, %v2789_v45  ;;  %v2095_v11 = vpop.permute.xlu1 %2094 }
 0x175   : > { %2791 = vmatmul.msk.bf16.vlgmr.msra.gmra.mxu1 %vm483_vm2, %v2789_v45  ;;  %1844 = vmatpush.bf16.msra.mxu0 %v1809_v49  ;;  %v2093_v15 = vpop.permute.xlu0 %2092  ;;  %v2101_v33 = vsel %vm761_vm6, %v2095_v11, %v2097_v17 }
 0x176   : > { %1894 = vmatpush.bf16.msra.mxu1 %v1879_v52  ;;  %v2110_v24 = vsel %vm487_vm1, %v2101_v33, 0  ;;  %v2100_v29 = vsel %vm761_vm6, %v2093_v15, %v2095_v11 }
 0x177   : > { %2792 = vmatmul.msk.bf16.vlgmr.msra.gmra.mxu2 %vm483_vm2, %v2789_v45  ;;  %v2107_v37 = vsel %vm487_vm1, %v2100_v29, 0 }
 0x178   : > { %1907 = vmatpush.bf16.msra.mxu2 %v1882_v51  ;;  %v2809_v51 = vld [vmem:[%s3600_s3 + $0x54] sm:$0xf] }
 0x179   : > { %v878_v13 = vpop.f32.mrf.mxu0 }
 0x17a   : > { %v940_v55 = vpop.f32.mrf.mxu2  ;;  %v891_v58 = vpop.f32.mrf.mxu1 }
 0x17b   : > { %v970_v57 = vadd.f32 %v940_v55, %v893_v25  ;;  %v955_v59 = vpop.f32.mrf.mxu3  ;;  %v2169_v45 = vpop.permute.xlu2 %2168 }
 0x17c   : > { %v2099_v7 = vpop.permute.xlu1 %2098 }
 0x17d   : > { %v2023_v25 = vpop.permute.xlu0 %2022  ;;  %v2102_v53 = vsel %vm761_vm6, %v2097_v17, %v2099_v7 }
 0x17e   : > { %v2026_v30 = vsel %vm684_vm5, %v2021_v61, %v2023_v25 }
 0x17f   : > { %2799 = vmatmul.msk.bf16.vlgmr.msrb.gmra.mxu3 %vm483_vm2, %v2797_v63  ;;  %v2037_v38 = vsel %vm487_vm1, %v2026_v30, 0 }
 0x180   : > { %2046 = vmatpush.bf16.msrb.mxu3 %v2031_v0  ;;  %v2113_v0 = vsel %vm487_vm1, %v2102_v53, 0 }
 0x181   : > { %v966_v40 = vpop.f32.mrf.mxu0 }
 0x182   : > { %v942_v39 = vpop.f32.mrf.mxu2  ;;  %v1017_v4 = vpop.f32.mrf.mxu1  ;;  %v972_v5 = vadd.f32 %v966_v40, %v895_v47 }
 0x183   : > { %v1047_v6 = vadd.f32 %v1017_v4, %v970_v57  ;;  %v1043_v9 = vpop.f32.mrf.mxu3  ;;  %v2176_v57 = vsel %vm838_vm7, %v2169_v45, %v2171_v26  ;;  %v2249_v1 = vpop.permute.xlu2 %2248 }
 0x184   : > { %v1049_v16 = vadd.f32 %v1043_v9, %v972_v5  ;;  %2795 = vmatmul.msk.bf16.vlgmr.msrb.gmra.mxu0 %vm483_vm2, %v2793_v35  ;;  %v2175_v42 = vpop.permute.xlu1 %2174  ;;  %v2183_v2 = vsel %vm487_vm1, %v2176_v57, 0 }
 0x185   : > { %2796 = vmatmul.msk.bf16.vlgmr.msrb.gmra.mxu1 %vm483_vm2, %v2793_v35  ;;  %1970 = vmatpush.bf16.msrb.mxu0 %v1955_v10  ;;  %v2173_v43 = vpop.permute.xlu0 %2172 }
 0x186   : > { %1983 = vmatpush.bf16.msrb.mxu1 %v1958_v8  ;;  %v2178_v50 = vsel %vm838_vm7, %v2173_v43, %v2175_v42  ;;  %v2177_v56 = vsel %vm838_vm7, %v2171_v26, %v2173_v43  ;;  %v2813_v8 = vld [vmem:[%s3600_s3 + $0x58] sm:$0xf] }
 0x187   : > { %2798 = vmatmul.msk.bf16.vlgmr.msrb.gmra.mxu2 %vm483_vm2, %v2797_v63  ;;  %v2189_v52 = vsel %vm487_vm1, %v2178_v50, 0  ;;  %v2186_v39 = vsel %vm487_vm1, %v2177_v56, 0 }
 0x188   : > { %1996 = vmatpush.bf16.msrb.mxu2 %v1961_v14 }
 0x189   : > { %v968_v20 = vpop.f32.mrf.mxu0 }
 0x18a   : > { %v1030_v18 = vpop.f32.mrf.mxu2  ;;  %v1019_v21 = vpop.f32.mrf.mxu1 }
 0x18b   : > { %v1048_v19 = vadd.f32 %v1030_v18, %v971_v54  ;;  %v1045_v22 = vpop.f32.mrf.mxu3  ;;  %v2323_v11 = vpop.permute.xlu2 %2322 }
 0x18c   : > { %v2247_v54 = vpop.permute.xlu1 %2246 }
 0x18d   : > { %v2245_v13 = vpop.permute.xlu0 %2244 }
 0x18e   : > { %v2252_v17 = vsel %vm915_vm8, %v2245_v13, %v2247_v54 }
 0x18f   : > { %2804 = vmatmul.msk.bf16.vlgmr.msra.gmra.mxu3 %vm483_vm2, %v2801_v23 }
 0x190   : > { %2135 = vmatpush.bf16.msra.mxu3 %v2110_v24  ;;  %v2259_v24 = vsel %vm487_vm1, %v2252_v17, 0 }
 0x191   : > { %v1094_v31 = vpop.f32.mrf.mxu0 }
 0x192   : > { %v1032_v28 = vpop.f32.mrf.mxu2  ;;  %v1107_v32 = vpop.f32.mrf.mxu1  ;;  %v1124_v34 = vadd.f32 %v1094_v31, %v1047_v6 }
 0x193   : > { %v1125_v12 = vadd.f32 %v1107_v32, %v1048_v19  ;;  %v1153_v35 = vpop.f32.mrf.mxu3  ;;  %v2253_v19 = vsel %vm915_vm8, %v2247_v54, %v2249_v1  ;;  %v2399_v31 = vpop.permute.xlu2 %2398 }
 0x194   : > { %v1183_v41 = vadd.f32 %v1153_v35, %v1124_v34  ;;  %2800 = vmatmul.msk.bf16.vlgmr.msra.gmra.mxu0 %vm483_vm2, %v2797_v63  ;;  %v2321_v14 = vpop.permute.xlu1 %2320  ;;  %v2262_v26 = vsel %vm487_vm1, %v2253_v19, 0 }
 0x195   : > { %2802 = vmatmul.msk.bf16.vlgmr.msra.gmra.mxu1 %vm483_vm2, %v2801_v23  ;;  %2059 = vmatpush.bf16.msra.mxu0 %v2034_v36  ;;  %v2251_v10 = vpop.permute.xlu0 %2250  ;;  %v2328_v15 = vsel %vm992_vm9, %v2321_v14, %v2323_v11  ;;  %v2829_v14 = vld [vmem:[%s3600_s3 + $0x68] sm:$0xf] }
 0x196   : > { %2072 = vmatpush.bf16.msra.mxu1 %v2037_v38  ;;  %v2254_v20 = vsel %vm915_vm8, %v2249_v1, %v2251_v10 }
 0x197   : > { %2803 = vmatmul.msk.bf16.vlgmr.msra.gmra.mxu2 %vm483_vm2, %v2801_v23  ;;  %v2265_v27 = vsel %vm487_vm1, %v2254_v20, 0 }
 0x198   : > { %2122 = vmatpush.bf16.msra.mxu2 %v2107_v37  ;;  %v2817_v37 = vld [vmem:[%s3600_s3 + $0x5c] sm:$0xf] }
 0x199   : > { %v1096_v47 = vpop.f32.mrf.mxu0 }
 0x19a   : > { %v1120_v44 = vpop.f32.mrf.mxu2  ;;  %v1109_v48 = vpop.f32.mrf.mxu1 }
 0x19b   : > { %v1126_v46 = vadd.f32 %v1120_v44, %v1049_v16  ;;  %v1155_v49 = vpop.f32.mrf.mxu3  ;;  %v2335_v16 = vsel %vm487_vm1, %v2328_v15, 0 }
 0x19d   : > { %v2325_v25 = vpop.permute.xlu0 %2324 }
 0x19e   : > { %v2329_v43 = vsel %vm992_vm9, %v2323_v11, %v2325_v25 }
 0x19f   : > { %2810 = vmatmul.msk.bf16.vlgmr.msrb.gmra.mxu3 %vm483_vm2, %v2809_v51 }
 0x1a0   : > { %2224 = vmatpush.bf16.msrb.mxu3 %v2189_v52  ;;  %v2397_v29 = vpop.permute.xlu1 %2396  ;;  %v2338_v52 = vsel %vm487_vm1, %v2329_v43, 0 }
 0x1a1   : > { %v1166_v58 = vpop.f32.mrf.mxu0  ;;  %v2404_v45 = vsel %vm1069_vm10, %v2397_v29, %v2399_v31 }
 0x1a2   : > { %v1122_v55 = vpop.f32.mrf.mxu2  ;;  %v1179_v59 = vpop.f32.mrf.mxu1  ;;  %v1184_v61 = vadd.f32 %v1166_v58, %v1125_v12  ;;  %v2411_v53 = vsel %vm487_vm1, %v2404_v45, 0 }
 0x1a3   : > { %v1185_v62 = vadd.f32 %v1179_v59, %v1126_v46  ;;  %v1242_v63 = vpop.f32.mrf.mxu3 }
 0x1a4   : > { %v1260_v3 = vadd.f32 %v1242_v63, %v1184_v61  ;;  %2806 = vmatmul.msk.bf16.vlgmr.msrb.gmra.mxu0 %vm483_vm2, %v2805_v60  ;;  %v2403_v61 = vpop.permute.xlu2 %2402 }
 0x1a5   : > { %2807 = vmatmul.msk.bf16.vlgmr.msrb.gmra.mxu1 %vm483_vm2, %v2805_v60  ;;  %2148 = vmatpush.bf16.msrb.mxu0 %v2113_v0  ;;  %v2401_v36 = vpop.permute.xlu0 %2400 }
 0x1a6   : > { %2198 = vmatpush.bf16.msrb.mxu1 %v2183_v2  ;;  %v2405_v38 = vsel %vm1069_vm10, %v2399_v31, %v2401_v36 }
 0x1a7   : > { %2808 = vmatmul.msk.bf16.vlgmr.msrb.gmra.mxu2 %vm483_vm2, %v2805_v60  ;;  %v2414_v42 = vsel %vm487_vm1, %v2405_v38, 0  ;;  %v2825_v60 = vld [vmem:[%s3600_s3 + $0x64] sm:$0xf] }
 0x1a8   : > { %2211 = vmatpush.bf16.msrb.mxu2 %v2186_v39  ;;  %v2821_v39 = vld [vmem:[%s3600_s3 + $0x60] sm:$0xf] }
 0x1a9   : > { %v1168_v5 = vpop.f32.mrf.mxu0 }
 0x1aa   : > { %v1229_v40 = vpop.f32.mrf.mxu2  ;;  %v1181_v6 = vpop.f32.mrf.mxu1 }
 0x1ab   : > { %v1259_v4 = vadd.f32 %v1229_v40, %v1183_v41  ;;  %v1244_v9 = vpop.f32.mrf.mxu3  ;;  %v2327_v41 = vpop.permute.xlu1 %2326 }
 0x1ac   : > { %v2330_v46 = vsel %vm992_vm9, %v2325_v25, %v2327_v41 }
 0x1ad   : > { %v2341_v54 = vsel %vm487_vm1, %v2330_v46, 0 }
 0x1af   : > { %2815 = vmatmul.msk.bf16.vlgmr.msra.gmra.mxu3 %vm483_vm2, %v2813_v8 }
 0x1b0   : > { %2350 = vmatpush.bf16.msra.mxu3 %v2335_v16 }
 0x1b1   : > { %v1255_v21 = vpop.f32.mrf.mxu0 }
 0x1b2   : > { %v1231_v18 = vpop.f32.mrf.mxu2  ;;  %v1305_v22 = vpop.f32.mrf.mxu1  ;;  %v1261_v33 = vadd.f32 %v1255_v21, %v1185_v62  ;;  %v2406_v62 = vsel %vm1069_vm10, %v2401_v36, %v2403_v61 }
 0x1b3   : > { %v1335_v7 = vadd.f32 %v1305_v22, %v1259_v4  ;;  %v1331_v23 = vpop.f32.mrf.mxu3  ;;  %v2417_v4 = vsel %vm487_vm1, %v2406_v62, 0 }
 0x1b4   : > { %v1337_v28 = vadd.f32 %v1331_v23, %v1261_v33  ;;  %2811 = vmatmul.msk.bf16.vlgmr.msra.gmra.mxu0 %vm483_vm2, %v2809_v51 }
 0x1b5   : > { %2812 = vmatmul.msk.bf16.vlgmr.msra.gmra.mxu1 %vm483_vm2, %v2809_v51  ;;  %2274 = vmatpush.bf16.msra.mxu0 %v2259_v24 }
 0x1b6   : > { %2287 = vmatpush.bf16.msra.mxu1 %v2262_v26 }
 0x1b7   : > { %2814 = vmatmul.msk.bf16.vlgmr.msra.gmra.mxu2 %vm483_vm2, %v2813_v8 }
 0x1b8   : > { %2300 = vmatpush.bf16.msra.mxu2 %v2265_v27 }
 0x1b9   : > { %v1257_v34 = vpop.f32.mrf.mxu0 }
 0x1ba   : > { %v1318_v30 = vpop.f32.mrf.mxu2  ;;  %v1307_v12 = vpop.f32.mrf.mxu1 }
 0x1bb   : > { %v1336_v32 = vadd.f32 %v1318_v30, %v1260_v3  ;;  %v1333_v35 = vpop.f32.mrf.mxu3 }
 0x1bf   : > { %2820 = vmatmul.msk.bf16.vlgmr.msrb.gmra.mxu3 %vm483_vm2, %v2817_v37 }
 0x1c0   : > { %2439 = vmatpush.bf16.msrb.mxu3 %v2414_v42 }
 0x1c1   : > { %v1381_v47 = vpop.f32.mrf.mxu0 }
 0x1c2   : > { %v1320_v44 = vpop.f32.mrf.mxu2  ;;  %v1394_v48 = vpop.f32.mrf.mxu1  ;;  %v1411_v49 = vadd.f32 %v1381_v47, %v1335_v7 }
 0x1c3   : > { %v1412_v50 = vadd.f32 %v1394_v48, %v1336_v32  ;;  %v1457_v51 = vpop.f32.mrf.mxu3 }
 0x1c4   : > { %v1487_v55 = vadd.f32 %v1457_v51, %v1411_v49  ;;  %2816 = vmatmul.msk.bf16.vlgmr.msrb.gmra.mxu0 %vm483_vm2, %v2813_v8 }
 0x1c5   : > { %2818 = vmatmul.msk.bf16.vlgmr.msrb.gmra.mxu1 %vm483_vm2, %v2817_v37  ;;  %2363 = vmatpush.bf16.msrb.mxu0 %v2338_v52 }
 0x1c6   : > { %2376 = vmatpush.bf16.msrb.mxu1 %v2341_v54 }
 0x1c7   : > { %2819 = vmatmul.msk.bf16.vlgmr.msrb.gmra.mxu2 %vm483_vm2, %v2817_v37 }
 0x1c8   : > { %2426 = vmatpush.bf16.msrb.mxu2 %v2411_v53 }
 0x1c9   : > { %v1383_v13 = vpop.f32.mrf.mxu0 }
 0x1ca   : > { %v1407_v56 = vpop.f32.mrf.mxu2  ;;  %v1396_v58 = vpop.f32.mrf.mxu1 }
 0x1cb   : > { %v1413_v57 = vadd.f32 %v1407_v56, %v1337_v28  ;;  %v1459_v59 = vpop.f32.mrf.mxu3 }
 0x1cf   : > { %2826 = vmatmul.msk.bf16.vlgmr.msra.gmra.mxu3 %vm483_vm2, %v2825_v60 }
 0x1d1   : > { %v1470_v0 = vpop.f32.mrf.mxu0 }
 0x1d2   : > { %v1409_v63 = vpop.f32.mrf.mxu2  ;;  %v1483_v1 = vpop.f32.mrf.mxu1  ;;  %v1488_v2 = vadd.f32 %v1470_v0, %v1412_v50 }
 0x1d3   : > { %v1489_v3 = vadd.f32 %v1483_v1, %v1413_v57  ;;  %v1546_v40 = vpop.f32.mrf.mxu3 }
 0x1d4   : > { %v1564_v5 = vadd.f32 %v1546_v40, %v1488_v2  ;;  %2822 = vmatmul.msk.bf16.vlgmr.msra.gmra.mxu0 %vm483_vm2, %v2821_v39 }
 0x1d5   : > { %2823 = vmatmul.msk.bf16.vlgmr.msra.gmra.mxu1 %vm483_vm2, %v2821_v39  ;;  %2452 = vmatpush.bf16.msra.mxu0 %v2417_v4 }
 0x1d7   : > { %2824 = vmatmul.msk.bf16.vlgmr.msra.gmra.mxu2 %vm483_vm2, %v2821_v39 }
 0x1d9   : > { %v1472_v10 = vpop.f32.mrf.mxu0 }
 0x1da   : > { %v1533_v6 = vpop.f32.mrf.mxu2  ;;  %v1485_v11 = vpop.f32.mrf.mxu1 }
 0x1db   : > { %v1563_v9 = vadd.f32 %v1533_v6, %v1487_v55  ;;  %v1548_v8 = vpop.f32.mrf.mxu3 }
 0x1df   : > { %2831 = vmatmul.msk.bf16.vlgmr.msrb.gmra.mxu3 %vm483_vm2, %v2829_v14 }
 0x1e1   : > { %v1559_v16 = vpop.f32.mrf.mxu0 }
 0x1e2   : > { %v1535_v15 = vpop.f32.mrf.mxu2  ;;  %v1609_v17 = vpop.f32.mrf.mxu1  ;;  %v1565_v18 = vadd.f32 %v1559_v16, %v1489_v3 }
 0x1e3   : > { %v1639_v19 = vadd.f32 %v1609_v17, %v1563_v9  ;;  %v1635_v20 = vpop.f32.mrf.mxu3 }
 0x1e4   : > { %v1641_v21 = vadd.f32 %v1635_v20, %v1565_v18  ;;  %2827 = vmatmul.msk.bf16.vlgmr.msrb.gmra.mxu0 %vm483_vm2, %v2825_v60 }
 0x1e5   : > { %2828 = vmatmul.msk.bf16.vlgmr.msrb.gmra.mxu1 %vm483_vm2, %v2825_v60 }
 0x1e7   : > { %2830 = vmatmul.msk.bf16.vlgmr.msrb.gmra.mxu2 %vm483_vm2, %v2829_v14 }
 0x1e9   : > { %v1561_v7 = vpop.f32.mrf.mxu0 }
 0x1ea   : > { %v1622_v22 = vpop.f32.mrf.mxu2  ;;  %v1611_v23 = vpop.f32.mrf.mxu1 }
 0x1eb   : > { %v1640_v33 = vadd.f32 %v1622_v22, %v1564_v5  ;;  %v1637_v24 = vpop.f32.mrf.mxu3 }
 0x1f1   : > { %v1685_v26 = vpop.f32.mrf.mxu0 }
 0x1f2   : > { %v1624_v25 = vpop.f32.mrf.mxu2  ;;  %v1698_v27 = vpop.f32.mrf.mxu1  ;;  %v1715_v28 = vadd.f32 %v1685_v26, %v1639_v19 }
 0x1f3   : > { %v1716_v29 = vadd.f32 %v1698_v27, %v1640_v33  ;;  %v1761_v30 = vpop.f32.mrf.mxu3 }
 0x1f4   : > { %v1791_v31 = vadd.f32 %v1761_v30, %v1715_v28  ;;  %2832 = vmatmul.msk.bf16.vlgmr.msra.gmra.mxu0 %vm483_vm2, %v2829_v14 }
 0x1f9   : > { %v1687_v12 = vpop.f32.mrf.mxu0 }
 0x1fa   : > { %v1711_v32 = vpop.f32.mrf.mxu2  ;;  %v1700_v35 = vpop.f32.mrf.mxu1 }
 0x1fb   : > { %v1717_v34 = vadd.f32 %v1711_v32, %v1641_v21  ;;  %v1763_v36 = vpop.f32.mrf.mxu3 }
 0x201   : > { %v1774_v38 = vpop.f32.mrf.mxu0 }
 0x202   : > { %v1713_v37 = vpop.f32.mrf.mxu2  ;;  %v1787_v41 = vpop.f32.mrf.mxu1  ;;  %v1792_v42 = vadd.f32 %v1774_v38, %v1716_v29 }
 0x203   : > { %v1793_v43 = vadd.f32 %v1787_v41, %v1717_v34  ;;  %v1833_v44 = vpop.f32.mrf.mxu3 }
 0x204   : > { %v1851_v45 = vadd.f32 %v1833_v44, %v1792_v42 }
 0x209   : > { %v1776_v48 = vpop.f32.mrf.mxu0 }
 0x20a   : > { %v1820_v46 = vpop.f32.mrf.mxu2  ;;  %v1789_v49 = vpop.f32.mrf.mxu1 }
 0x20b   : > { %v1850_v47 = vadd.f32 %v1820_v46, %v1791_v31  ;;  %v1835_v50 = vpop.f32.mrf.mxu3 }
 0x211   : > { %v1846_v52 = vpop.f32.mrf.mxu0 }
 0x212   : > { %v1822_v51 = vpop.f32.mrf.mxu2  ;;  %v1896_v53 = vpop.f32.mrf.mxu1  ;;  %v1852_v54 = vadd.f32 %v1846_v52, %v1793_v43 }
 0x213   : > { %v1926_v55 = vadd.f32 %v1896_v53, %v1850_v47  ;;  %v1922_v56 = vpop.f32.mrf.mxu3 }
 0x214   : > { %v1928_v57 = vadd.f32 %v1922_v56, %v1852_v54 }
 0x219   : > { %v1848_v59 = vpop.f32.mrf.mxu0 }
 0x21a   : > { %v1909_v13 = vpop.f32.mrf.mxu2  ;;  %v1898_v60 = vpop.f32.mrf.mxu1 }
 0x21b   : > { %v1927_v58 = vadd.f32 %v1909_v13, %v1851_v45  ;;  %v1924_v61 = vpop.f32.mrf.mxu3  ;;  %v2465_v45 = vld [vmem:[%s3601_s4] sm:$0x7] }
 0x21c   : > { %v2468_v49 = vperm.slane %v2465_v45, 1  ;;  %v2467_v52 = vperm.slane %v2465_v45, 0 }
 0x221   : > { %v1972_v63 = vpop.f32.mrf.mxu0 }
 0x222   : > { %v1911_v62 = vpop.f32.mrf.mxu2  ;;  %v1985_v0 = vpop.f32.mrf.mxu1  ;;  %v2002_v28 = vadd.f32 %v1972_v63, %v1926_v55 }
 0x223   : > { %v2048_v1 = vpop.f32.mrf.mxu3  ;;  %v2003_v25 = vadd.f32 %v1985_v0, %v1927_v58 }
 0x224   : > { %v2078_v34 = vadd.f32 %v2048_v1, %v2002_v28 }
 0x229   : > { %v1974_v2 = vpop.f32.mrf.mxu0 }
 0x22a   : > { %v1998_v39 = vpop.f32.mrf.mxu2  ;;  %v1987_v3 = vpop.f32.mrf.mxu1 }
 0x22b   : > { %v2050_v40 = vpop.f32.mrf.mxu3  ;;  %v2004_v47 = vadd.f32 %v1998_v39, %v1928_v57 }
 0x22c   : > { %v2469_v40 = vperm.slane %v2465_v45, 2 }
 0x231   : > { %v2061_v5 = vpop.f32.mrf.mxu0 }
 0x232   : > { %v2000_v4 = vpop.f32.mrf.mxu2  ;;  %v2074_v6 = vpop.f32.mrf.mxu1  ;;  %v2079_v26 = vadd.f32 %v2061_v5, %v2003_v25 }
 0x233   : > { %v2137_v9 = vpop.f32.mrf.mxu3  ;;  %v2080_v50 = vadd.f32 %v2074_v6, %v2004_v47 }
 0x234   : > { %v2155_v32 = vadd.f32 %v2137_v9, %v2079_v26 }
 0x239   : > { %v2063_v11 = vpop.f32.mrf.mxu0 }
 0x23a   : > { %v2124_v10 = vpop.f32.mrf.mxu2  ;;  %v2076_v8 = vpop.f32.mrf.mxu1 }
 0x23b   : > { %v2139_v14 = vpop.f32.mrf.mxu3  ;;  %v2154_v35 = vadd.f32 %v2124_v10, %v2078_v34 }
 0x241   : > { %v2150_v16 = vpop.f32.mrf.mxu0 }
 0x242   : > { %v2126_v15 = vpop.f32.mrf.mxu2  ;;  %v2200_v17 = vpop.f32.mrf.mxu1  ;;  %v2156_v53 = vadd.f32 %v2150_v16, %v2080_v50 }
 0x243   : > { %v2226_v18 = vpop.f32.mrf.mxu3  ;;  %v2230_v38 = vadd.f32 %v2200_v17, %v2154_v35  ;;  %v2482_v15 = vlaneseq  ;;  %v2476_v17 = vld [vmem:[%s3079_s9] sm:$0x1] }
 0x244   : > { %v2232_v62 = vadd.f32 %v2226_v18, %v2156_v53 }
 0x245   : > { %v2483_v16 = vand.u32 127, %v2482_v15 }
 0x249   : > { %v2152_v20 = vpop.f32.mrf.mxu0 }
 0x24a   : > { %v2213_v19 = vpop.f32.mrf.mxu2  ;;  %v2202_v21 = vpop.f32.mrf.mxu1  ;;  %v2489_v20 = vld [vmem:[%s3079_s9 + $0x1] sm:$0x1] }
 0x24b   : > { %v2228_v22 = vpop.f32.mrf.mxu3  ;;  %v2231_v12 = vadd.f32 %v2213_v19, %v2155_v32 }
 0x251   : > { %v2276_v7 = vpop.f32.mrf.mxu0 }
 0x252   : > { %v2215_v33 = vpop.f32.mrf.mxu2  ;;  %v2289_v23 = vpop.f32.mrf.mxu1  ;;  %v2306_v46 = vadd.f32 %v2276_v7, %v2230_v38 }
 0x253   : > { %v2352_v24 = vpop.f32.mrf.mxu3  ;;  %v2307_v36 = vadd.f32 %v2289_v23, %v2231_v12 }
 0x254   : > { %v2382_v51 = vadd.f32 %v2352_v24, %v2306_v46 }
 0x259   : > { %v2278_v29 = vpop.f32.mrf.mxu0 }
 0x25a   : > { %v2302_v27 = vpop.f32.mrf.mxu2  ;;  %v2291_v30 = vpop.f32.mrf.mxu1 }
 0x25b   : > { %v2354_v31 = vpop.f32.mrf.mxu3  ;;  %v2308_v1 = vadd.f32 %v2302_v27, %v2232_v62 }
 0x261   : > { %v2365_v41 = vpop.f32.mrf.mxu0 }
 0x262   : > { %v2304_v37 = vpop.f32.mrf.mxu2  ;;  %v2378_v42 = vpop.f32.mrf.mxu1  ;;  %v2383_v43 = vadd.f32 %v2365_v41, %v2307_v36 }
 0x263   : > { %v2441_v44 = vpop.f32.mrf.mxu3  ;;  %v2384_v2 = vadd.f32 %v2378_v42, %v2308_v1 }
 0x264   : > { %v2459_v48 = vadd.f32 %v2441_v44, %v2383_v43 }
 0x266   : > { %v2474_v55 = vmul.f32 %v2468_v49, %v2459_v48 }
 0x268   : > { %v2491_v63 = vmul.f32 %v2474_v55, %v2459_v48 }
 0x269   : > { %v2367_v13 = vpop.f32.mrf.mxu0 }
 0x26a   : > { %v2428_v54 = vpop.f32.mrf.mxu2  ;;  %v2380_v58 = vpop.f32.mrf.mxu1 }
 0x26b   : > { %v2458_v56 = vadd.f32 %v2428_v54, %v2382_v51  ;;  %v2443_v59 = vpop.f32.mrf.mxu3 }
 0x26d   : > { %v2461_v60 = vpack.c.bf16 %v2459_v48, %v2458_v56  ;;  %v2473_v61 = vmul.f32 %v2467_v52, %v2458_v56 }
 0x26f   : > { %2463 = vst [vmem:[%s3072_s0] sm:$0xff] %v2461_v60  ;;  %v2490_v57 = vmul.f32 %v2473_v61, %v2458_v56  ;;  %v2477_v0 = vadd.f32 %v2474_v55, %v2473_v61 }
 0x271   : > { %v2493_v39 = vadd.f32 %v2491_v63, %v2490_v57  ;;  %v2454_v4 = vpop.f32.mrf.mxu0 }
 0x272   : > { %v2430_v3 = vpop.f32.mrf.mxu2  ;;  %v2460_v5 = vadd.f32 %v2454_v4, %v2384_v2 }
 0x274   : > { %v2462_v6 = vpack.c.bf16 %v2460_v5, %v2460_v5  ;;  %v2475_v9 = vmul.f32 %v2469_v40, %v2460_v5 }
 0x276   : > { %2464 = vst [vmem:[%s3072_s0 + $0x8] sm:$0xf] %v2462_v6  ;;  %v2478_v10 = vadd.f32 %v2477_v0, %v2475_v9  ;;  %v2492_v11 = vmul.f32 %v2475_v9, %v2460_v5 }
 0x278   : > { %2479 = vadd.xlane.f32.xlu0 %v2478_v10  ;;  %v2494_v8 = vadd.f32 %v2493_v39, %v2492_v11 }
 0x279   : > { %v2456_v14 = vpop.f32.mrf.mxu0 }
 0x27a   : > { %2495 = vadd.xlane.f32.xlu1 %v2494_v8 }
 0x2eb   : > { %v2480_v18 = vpop.xlane.xlu0 %2479 }
 0x2ec   : > { %v2484_v19 = vperm.slane %v2480_v18, %v2483_v16 }
 0x2ed   : > { %v2496_v21 = vpop.xlane.xlu1 %2495 }
 0x2ee   : > { %v2486_v22 = vadd.f32 %v2484_v19, %v2476_v17  ;;  %v2498_v33 = vperm.slane %v2496_v21, %v2483_v16 }
 0x2f0   : > { %2488 = vst.msk [vmem:[%s3079_s9] sm:$0x1] %vm2487_vm11, %v2486_v22  ;;  %v2500_v7 = vadd.f32 %v2498_v33, %v2489_v20 }
 0x2f2   : > { %2501 = vst.msk [vmem:[%s3079_s9 + $0x1] sm:$0x1] %vm2487_vm11, %v2500_v7 }
 0x2f3 PF: > { %s17_s27 = sadd.s32 1, %s2957_s27   ;;  %s3613_s23 = sld [smem:[#allocation2_spill]] }
 0x2f4   : > { %p14_p13 = scmp.ge.s32.totalorder %s17_s27, 34   ;;  %s3614_s0 = sld [smem:[#allocation3_spill]] }
 0x2f5   : > { %s3615_s1 = sld [smem:[#allocation4_spill]]  ;;  %s3617_s21 = smov %s2945_s24 }
 0x2f6   : > { %s3616_s26 = sld [smem:[#allocation5_spill]]  ;;  %s3618_s22 = smov %s2949_s25 }
 0x2f7   :  { %16 = sbr.rel (!%p14_p13) target bundleno = 5 (0x5), region = 118 }
 0x2fa   : > { %s3619_s24 = smov %s3614_s0 }
 0x2fb   : > { %s3620_s25 = smov %s3615_s1 }

</bundles_post_ra>
